<compile_context>
chip_gen: v7x
topology: tpu7x:2x2x1
jax: 0.10.0
libtpu: 0.0.40
codegen_flags: <defaults>
</compile_context>

<pallas_src>
import functools
import math

import jax
import jax.numpy as jnp
from jax.experimental import pallas as pl
from jax.experimental.pallas import tpu as pltpu


def _round_up(n, m):
    return ((n + m - 1) // m) * m


# ----------------------------------------------------------------------------
# Device-generation gating (trace-time constants)
# ----------------------------------------------------------------------------

def _device_kind():
    try:
        return jax.devices()[0].device_kind.lower()
    except Exception:
        return ""


_KIND = _device_kind()
# v7x has 2 TensorCores per chip -> split row grids so ("parallel",) shards them.
_NUM_TC = 2 if "v7" in _KIND else 1
# v5e has no bf16 VALU -> keep bias/ReLU elementwise math in f32 there.
_EW_DTYPE = jnp.float32 if "v5" in _KIND else jnp.bfloat16
_COMPUTE_DTYPE = jnp.bfloat16   # MXU operand dtype (f32 accumulation everywhere)


def _row_tile(n, tm, align=16):
    """Row-tile size: <= tm, aligned, and split >=2 ways on multi-TC chips."""
    tm = min(tm, _round_up(n, align))
    if _NUM_TC > 1 and n > align:
        tm = min(tm, _round_up(-(-n // _NUM_TC), align))
    return max(tm, align)


# ----------------------------------------------------------------------------
# Pallas kernels
# ----------------------------------------------------------------------------

def _mlp2_kernel(x_ref, w1_ref, b1_ref, w2_ref, b2_ref, o_ref, *, ew_dtype):
    # (tm,Cin)@(Cin,Ch) -> +bias -> relu -> @(Ch,Cout) -> +bias
    # bf16 MXU operands, f32 accumulation; bias/ReLU in ew_dtype (bf16 on
    # v6e/v7x, f32 on v5e), final bias add in f32, store in o_ref.dtype.
    h = jnp.dot(x_ref[...], w1_ref[...], preferred_element_type=jnp.float32)
    h = jnp.maximum(h.astype(ew_dtype) + b1_ref[...].astype(ew_dtype), 0.0)
    y = jnp.dot(h.astype(w2_ref.dtype), w2_ref[...],
                preferred_element_type=jnp.float32) + b2_ref[...]
    o_ref[...] = y.astype(o_ref.dtype)


def _query_refpts_kernel(x_ref,
                         qw1_ref, qb1_ref, qw2_ref, qb2_ref,
                         rw1_ref, rb1_ref, rw2_ref, rb2_ref, rw3_ref, rb3_ref,
                         qe_ref, rp_ref, *, ew_dtype):
    """Fused query_embedding (Linear,ReLU,Linear) + reference_points
    (Linear,ReLU,Linear,ReLU,Linear->sigmoid).  Two outputs, one kernel:
    the query_embeds intermediate never leaves VMEM."""
    x = x_ref[...]
    # query_embedding
    h = jnp.dot(x, qw1_ref[...], preferred_element_type=jnp.float32)
    h = jnp.maximum(h.astype(ew_dtype) + qb1_ref[...].astype(ew_dtype), 0.0)
    qe = jnp.dot(h.astype(qw2_ref.dtype), qw2_ref[...],
                 preferred_element_type=jnp.float32) + qb2_ref[...]
    qe_ref[...] = qe.astype(qe_ref.dtype)
    # reference_points consumes query_embeds (f32) directly from registers/VMEM
    g = jnp.dot(qe.astype(rw1_ref.dtype), rw1_ref[...],
                preferred_element_type=jnp.float32)
    g = jnp.maximum(g.astype(ew_dtype) + rb1_ref[...].astype(ew_dtype), 0.0)
    g = jnp.dot(g.astype(rw2_ref.dtype), rw2_ref[...],
                preferred_element_type=jnp.float32)
    g = jnp.maximum(g.astype(ew_dtype) + rb2_ref[...].astype(ew_dtype), 0.0)
    # final layer's output columns are zero-padded to 128 lanes -> unmasked store
    r = jnp.dot(g.astype(rw3_ref.dtype), rw3_ref[...],
                preferred_element_type=jnp.float32) + rb3_ref[...]
    rp_ref[...] = jax.nn.sigmoid(r).astype(rp_ref.dtype)


# ----------------------------------------------------------------------------
# Wrappers around pallas_call
# ----------------------------------------------------------------------------

def conv1x1_mlp(x, w1, b1, w2, b2, *, tm=1024, out_dtype=jnp.bfloat16):
    """y = relu(x @ w1 + b1) @ w2 + b2, tiled over rows (1x1-conv MLP).

    Weights are expected already in compute dtype (bf16), biases as (1,C) f32
    (see prepare_params).  Rows tiled with a cdiv grid (ragged last block
    handled by Pallas masking).  Output columns lane-padded to 128 if needed.
    tm=1024 keeps live VMEM (~4-5 MiB) well inside v5e's 16 MiB and v7x's
    32 MiB scoped-VMEM defaults.
    """
    n, cin = x.shape
    ch = w1.shape[1]
    cout = w2.shape[1]
    cpad = _round_up(cout, 128)
    if cpad != cout:
        w2 = jnp.pad(w2, ((0, 0), (0, cpad - cout)))
        b2 = jnp.pad(b2, ((0, 0), (0, cpad - cout)))
    tm = _row_tile(n, tm)
    grid = (pl.cdiv(n, tm),)
    kernel = functools.partial(_mlp2_kernel, ew_dtype=_EW_DTYPE)
    out = pl.pallas_call(
        kernel,
        out_shape=jax.ShapeDtypeStruct((n, cpad), out_dtype),
        grid=grid,
        in_specs=[
            pl.BlockSpec((tm, cin), lambda i: (i, 0)),
            pl.BlockSpec((cin, ch), lambda i: (0, 0)),
            pl.BlockSpec((1, ch), lambda i: (0, 0)),
            pl.BlockSpec((ch, cpad), lambda i: (0, 0)),
            pl.BlockSpec((1, cpad), lambda i: (0, 0)),
        ],
        out_specs=pl.BlockSpec((tm, cpad), lambda i: (i, 0)),
        compiler_params=pltpu.CompilerParams(
            dimension_semantics=("parallel",)),
    )(x.astype(_COMPUTE_DTYPE), w1, b1, w2, b2)
    if cpad != cout:
        out = out[:, :cout]
    return out


def query_and_reference_points(qflat, p, *, rout, tm=512):
    """Fused query_embedding + reference_points over (rows, C) queries.

    Returns (query_embeds (R,C) bf16, reference_points (R,rout) f32).
    Weights in `p` are pre-cast bf16; rp_w3/rp_b3 pre-padded to 128 lanes;
    biases pre-reshaped (1,C) f32 (prepare_params).  Pad columns carry
    sigmoid(0)=0.5 and are sliced off here — never pass the padded buffer on.
    """
    R, C = qflat.shape
    rpad = p['rp_w3'].shape[1]
    tm = _row_tile(R, tm)
    grid = (pl.cdiv(R, tm),)
    kernel = functools.partial(_query_refpts_kernel, ew_dtype=_EW_DTYPE)
    qe, rp = pl.pallas_call(
        kernel,
        out_shape=(jax.ShapeDtypeStruct((R, C), jnp.bfloat16),
                   jax.ShapeDtypeStruct((R, rpad), jnp.float32)),
        grid=grid,
        in_specs=[
            pl.BlockSpec((tm, C), lambda i: (i, 0)),
            pl.BlockSpec((C, C), lambda i: (0, 0)),
            pl.BlockSpec((1, C), lambda i: (0, 0)),
            pl.BlockSpec((C, C), lambda i: (0, 0)),
            pl.BlockSpec((1, C), lambda i: (0, 0)),
            pl.BlockSpec((C, C), lambda i: (0, 0)),
            pl.BlockSpec((1, C), lambda i: (0, 0)),
            pl.BlockSpec((C, C), lambda i: (0, 0)),
            pl.BlockSpec((1, C), lambda i: (0, 0)),
            pl.BlockSpec((C, rpad), lambda i: (0, 0)),
            pl.BlockSpec((1, rpad), lambda i: (0, 0)),
        ],
        out_specs=(pl.BlockSpec((tm, C), lambda i: (i, 0)),
                   pl.BlockSpec((tm, rpad), lambda i: (i, 0))),
        compiler_params=pltpu.CompilerParams(
            dimension_semantics=("parallel",)),
    )(qflat.astype(_COMPUTE_DTYPE),
      p['qe_w1'], p['qe_b1'], p['qe_w2'], p['qe_b2'],
      p['rp_w1'], p['rp_b1'], p['rp_w2'], p['rp_b2'],
      p['rp_w3'], p['rp_b3'])
    return qe, rp[:, :rout]


# ----------------------------------------------------------------------------
# Plain-JAX glue: SinePositionalEncoding on an all-zero mask (constant gen)
# ----------------------------------------------------------------------------

def sine_positional_encoding(mask, num_feats, temperature=10000.0,
                             scale=2.0 * math.pi, eps=1e-6):
    """mmdet SinePositionalEncoding(normalize=True).  mask: (B, H, W)."""
    not_mask = 1.0 - mask.astype(jnp.float32)
    y_embed = jnp.cumsum(not_mask, axis=1)
    x_embed = jnp.cumsum(not_mask, axis=2)
    y_embed = y_embed / (y_embed[:, -1:, :] + eps) * scale
    x_embed = x_embed / (x_embed[:, :, -1:] + eps) * scale
    dim_t = jnp.arange(num_feats, dtype=jnp.float32)
    dim_t = temperature ** (2.0 * jnp.floor(dim_t / 2.0) / num_feats)
    pos_x = x_embed[..., None] / dim_t
    pos_y = y_embed[..., None] / dim_t
    B, H, W = mask.shape
    pos_x = jnp.stack([jnp.sin(pos_x[..., 0::2]), jnp.cos(pos_x[..., 1::2])],
                      axis=4).reshape(B, H, W, -1)
    pos_y = jnp.stack([jnp.sin(pos_y[..., 0::2]), jnp.cos(pos_y[..., 1::2])],
                      axis=4).reshape(B, H, W, -1)
    pos = jnp.concatenate([pos_y, pos_x], axis=3)   # (B, H, W, 2*num_feats)
    return jnp.transpose(pos, (0, 3, 1, 2))         # (B, C, H, W)  NCHW


# ----------------------------------------------------------------------------
# Parameter construction (deterministic, shapes follow LATRHead.__init__)
# ----------------------------------------------------------------------------

def _xavier_uniform(key, shape):
    fan_in, fan_out = shape
    bound = math.sqrt(6.0 / (fan_in + fan_out))
    return jax.random.uniform(key, shape, jnp.float32, -bound, bound)


def make_params(key, embed_dims, code_size, num_pt_per_line, num_levels=1):
    C = embed_dims
    keys = jax.random.split(key, 16)
    p = {}
    # adapt_pos3d: Conv1x1(C -> 4C) + ReLU + Conv1x1(4C -> C)
    p['ap_w1'] = jax.random.normal(keys[0], (C, 4 * C)) * 0.02
    p['ap_b1'] = jnp.zeros((4 * C,), jnp.float32)
    p['ap_w2'] = jax.random.normal(keys[1], (4 * C, C)) * 0.02
    p['ap_b2'] = jnp.zeros((C,), jnp.float32)
    # query_embedding: Linear(C,C) + ReLU + Linear(C,C)
    p['qe_w1'] = jax.random.normal(keys[2], (C, C)) * 0.02
    p['qe_b1'] = jnp.zeros((C,), jnp.float32)
    p['qe_w2'] = jax.random.normal(keys[3], (C, C)) * 0.02
    p['qe_b2'] = jnp.zeros((C,), jnp.float32)
    # reference_points: Linear,ReLU,Linear,ReLU,Linear(C -> 2*code/P), xavier, bias=0
    ref_out = 2 * code_size // num_pt_per_line
    p['rp_w1'] = _xavier_uniform(keys[4], (C, C))
    p['rp_b1'] = jnp.zeros((C,), jnp.float32)
    p['rp_w2'] = _xavier_uniform(keys[5], (C, C))
    p['rp_b2'] = jnp.zeros((C,), jnp.float32)
    p['rp_w3'] = _xavier_uniform(keys[6], (C, ref_out))
    p['rp_b3'] = jnp.zeros((ref_out,), jnp.float32)
    # point_embedding (nn.Embedding default: N(0,1)), level_embeds (normal_)
    p['point_emb'] = jax.random.normal(keys[7], (num_pt_per_line, C))
    p['level_embeds'] = jax.random.normal(keys[8], (num_levels, C))
    return p


def prepare_params(p, compute_dtype=_COMPUTE_DTYPE):
    """One-time weight preparation (feedback: hoist per-call casts/pads/reshapes).

    Weights -> bf16; reference_points last layer zero-padded to 128 output
    lanes; biases -> explicit f32, shape (1, C).
    """
    rout = p['rp_w3'].shape[1]
    rpad = _round_up(rout, 128)

    def w(a):
        return jnp.asarray(a, compute_dtype)

    def b(a):
        return jnp.asarray(a, jnp.float32).reshape(1, -1)

    return dict(
        ap_w1=w(p['ap_w1']), ap_b1=b(p['ap_b1']),
        ap_w2=w(p['ap_w2']), ap_b2=b(p['ap_b2']),
        qe_w1=w(p['qe_w1']), qe_b1=b(p['qe_b1']),
        qe_w2=w(p['qe_w2']), qe_b2=b(p['qe_b2']),
        rp_w1=w(p['rp_w1']), rp_b1=b(p['rp_b1']),
        rp_w2=w(p['rp_w2']), rp_b2=b(p['rp_b2']),
        rp_w3=w(jnp.pad(p['rp_w3'], ((0, 0), (0, rpad - rout)))),
        rp_b3=b(jnp.pad(p['rp_b3'], ((0, rpad - rout),))),
        point_emb=jnp.asarray(p['point_emb'], jnp.float32),
        level_embeds=jnp.asarray(p['level_embeds'], jnp.float32),
    )


# ----------------------------------------------------------------------------
# One-time constant precompute: all-zero-mask sine PE + adapt_pos3d
# ----------------------------------------------------------------------------

def precompute_sin_embed(prepared, B, C, H, W):
    """masks are all zeros in LATRHead.forward, so this is a constant for
    fixed (B,C,H,W).  Run once at setup and reuse every forward."""
    masks = jnp.zeros((B, H, W), jnp.float32)
    sin_embed = sine_positional_encoding(masks, num_feats=C // 2)     # (B,C,H,W)
    se = jnp.transpose(sin_embed, (0, 2, 3, 1)).reshape(B * H * W, C)
    se = conv1x1_mlp(se, prepared['ap_w1'], prepared['ap_b1'],
                     prepared['ap_w2'], prepared['ap_b2'])            # bf16
    return jnp.transpose(se.reshape(B, H, W, C), (0, 3, 1, 2))        # (B,C,H,W)


# ----------------------------------------------------------------------------
# Forward (LATRHead.forward up to — but not including — the transformer)
# ----------------------------------------------------------------------------

def latr_head_forward(img_feats, inst_features, sin_embed_adapted, prepared,
                      *, ref_out):
    B, C, H, W = img_feats.shape

    # query = inst_features.unsqueeze(2) + point_embedding
    # (tiny broadcast add + bf16 cast — fused by XLA under jit; the two MLPs
    #  that consume it are fused into ONE Pallas kernel below)
    query = inst_features[:, :, None, :] + prepared['point_emb'][None, None, :, :]
    B_, Q, P, _ = query.shape
    qflat = query.reshape(B_ * Q * P, C)

    # fused query_embedding MLP + reference_points MLP + sigmoid (one Pallas call)
    query_embeds, ref = query_and_reference_points(qflat, prepared, rout=ref_out)
    query_embeds = query_embeds.reshape(B_, Q * P, C)
    query_tgt = jnp.zeros_like(query_embeds)
    reference_points = ref.reshape(B_, Q * P, ref_out)

    # feat_flatten: (B,C,H,W) -> flatten(2).permute(2,0,1) + level_embeds[0]
    # (feedback: dropped the standalone Pallas add — XLA fuses the broadcast
    #  add into the transpose copy, one HBM pass instead of two)
    feat_flat = (jnp.transpose(img_feats.reshape(B, C, H * W), (2, 0, 1))
                 + prepared['level_embeds'][0][None, None, :])         # (HW,B,C)

    spatial_shapes = jnp.array([[H, W]], dtype=jnp.int32)
    level_start_index = jnp.array([0], dtype=jnp.int32)

    # TODO(synk): self.transformer / cls_branches / reg_branches / losses are external.
    return dict(
        sin_embed=sin_embed_adapted,
        query=query_tgt,
        query_embeds=query_embeds,
        reference_points=reference_points,
        feat_flatten=feat_flat,
        spatial_shapes=spatial_shapes,
        level_start_index=level_start_index,
    )


# ----------------------------------------------------------------------------
# Main
# ----------------------------------------------------------------------------

if __name__ == "__main__":
    key = jax.random.PRNGKey(0)
    k_feat, k_inst, k_par = jax.random.split(key, 3)

    # small shapes, module defaults where it matters (embed_dims = 128)
    B, C, H, W = 2, 128, 8, 16
    num_query = 30
    num_pt_per_line = 5
    code_size = 10           # pred_dim
    ref_out = 2 * code_size // num_pt_per_line

    params = make_params(k_par, embed_dims=C, code_size=code_size,
                         num_pt_per_line=num_pt_per_line)
    prepared = prepare_params(params)

    img_feats = jax.random.normal(k_feat, (B, C, H, W), jnp.float32)   # NCHW
    # TODO(synk): inst_features normally comes from SparseInsDecoder (external).
    inst_features = jax.random.normal(k_inst, (B, num_query, C), jnp.float32)

    # one-time constant precompute (all-zero masks -> PE -> adapt_pos3d Pallas MLP)
    sin_embed_adapted = jax.block_until_ready(
        precompute_sin_embed(prepared, B, C, H, W))

    fwd = jax.jit(functools.partial(latr_head_forward, ref_out=ref_out))
    out = jax.block_until_ready(
        fwd(img_feats, inst_features, sin_embed_adapted, prepared))

    # shape / range sanity checks
    assert out['sin_embed'].shape == (B, C, H, W)
    assert out['query_embeds'].shape == (B, num_query * num_pt_per_line, C)
    assert out['reference_points'].shape == (B, num_query * num_pt_per_line, ref_out)
    assert out['feat_flatten'].shape == (H * W, B, C)
    assert bool(jnp.all(jnp.isfinite(out['reference_points'])))
    assert bool(jnp.all((out['reference_points'] >= 0.0)
                        & (out['reference_points'] <= 1.0)))

    # f32 pure-JAX reference: tolerance check of the bf16 Pallas path
    query_ref = inst_features[:, :, None, :] + params['point_emb'][None, None, :, :]
    qflat_ref = query_ref.reshape(-1, C)
    h = jnp.maximum(qflat_ref @ params['qe_w1'] + params['qe_b1'], 0.0)
    qe_ref = h @ params['qe_w2'] + params['qe_b2']
    g = jnp.maximum(qe_ref @ params['rp_w1'] + params['rp_b1'], 0.0)
    g = jnp.maximum(g @ params['rp_w2'] + params['rp_b2'], 0.0)
    rp_ref = jax.nn.sigmoid(g @ params['rp_w3'] + params['rp_b3'])

    masks = jnp.zeros((B, H, W), jnp.float32)
    sin = sine_positional_encoding(masks, num_feats=C // 2)
    se_in = jnp.transpose(sin, (0, 2, 3, 1)).reshape(B * H * W, C)
    se_ref = (jnp.maximum(se_in @ params['ap_w1'] + params['ap_b1'], 0.0)
              @ params['ap_w2'] + params['ap_b2'])
    se_ref = jnp.transpose(se_ref.reshape(B, H, W, C), (0, 3, 1, 2))

    qe_err = float(jnp.max(jnp.abs(
        out['query_embeds'].astype(jnp.float32).reshape(-1, C) - qe_ref)))
    rp_err = float(jnp.max(jnp.abs(
        out['reference_points'].reshape(-1, ref_out) - rp_ref)))
    se_err = float(jnp.max(jnp.abs(
        out['sin_embed'].astype(jnp.float32) - se_ref)))
    assert qe_err < 2e-2, f"query_embeds mismatch: {qe_err}"
    assert rp_err < 2e-2, f"reference_points mismatch: {rp_err}"
    assert se_err < 2e-2, f"sin_embed mismatch: {se_err}"

    print("KERNEL_OK")
</pallas_src>

<mosaic_0001>
module attributes {stable_mosaic.version = 11 : i64} {
  func.func @_mlp2_kernel(%arg0: i32, %arg1: memref<256x128xbf16, #tpu.memory_space<vmem>>, %arg2: memref<128x512xbf16, #tpu.memory_space<vmem>>, %arg3: memref<1x512xf32, #tpu.memory_space<vmem>>, %arg4: memref<512x128xbf16, #tpu.memory_space<vmem>>, %arg5: memref<1x128xf32, #tpu.memory_space<vmem>>, %arg6: memref<256x128xbf16, #tpu.memory_space<vmem>>) attributes {dimension_semantics = [#tpu.dimension_semantics<parallel>], iteration_bounds = array<i64: 1>, scalar_prefetch = 0 : i64, scratch_operands = 0 : i64, tpu.core_type = #tpu.core_type<tc>, window_params = [{transform_indices = @transform_0, window_bounds = array<i64: 256, 128>}, {pipeline_mode = #tpu.pipeline_mode<synchronous>, transform_indices = @transform_1, window_bounds = array<i64: 128, 512>}, {pipeline_mode = #tpu.pipeline_mode<synchronous>, transform_indices = @transform_2, window_bounds = array<i64: 1, 512>}, {pipeline_mode = #tpu.pipeline_mode<synchronous>, transform_indices = @transform_3, window_bounds = array<i64: 512, 128>}, {pipeline_mode = #tpu.pipeline_mode<synchronous>, transform_indices = @transform_4, window_bounds = array<i64: 1, 128>}, {transform_indices = @transform_5, window_bounds = array<i64: 256, 128>}]} {
    %c0 = arith.constant 0 : index
    %c0_0 = arith.constant 0 : index
    %0 = vector.load %arg1[%c0, %c0_0] : memref<256x128xbf16, #tpu.memory_space<vmem>>, vector<256x128xbf16>
    %c0_1 = arith.constant 0 : index
    %c0_2 = arith.constant 0 : index
    %1 = vector.load %arg2[%c0_1, %c0_2] : memref<128x512xbf16, #tpu.memory_space<vmem>>, vector<128x512xbf16>
    %cst = arith.constant dense<0.000000e+00> : vector<256x512xf32>
    %2 = tpu.matmul %0, %1, %cst {dimension_numbers = #tpu.dot_dimension_numbers<[1], [0], [0], [1], [0, 0, 1, 1], [], []>} : vector<256x128xbf16>, vector<128x512xbf16>, vector<256x512xf32> -> vector<256x512xf32>
    %3 = arith.truncf %2 : vector<256x512xf32> to vector<256x512xbf16>
    %c0_3 = arith.constant 0 : index
    %c0_4 = arith.constant 0 : index
    %4 = vector.load %arg3[%c0_3, %c0_4] : memref<1x512xf32, #tpu.memory_space<vmem>>, vector<1x512xf32>
    %5 = arith.truncf %4 : vector<1x512xf32> to vector<1x512xbf16>
    %6 = vector.broadcast %5 : vector<1x512xbf16> to vector<256x512xbf16>
    %7 = arith.addf %3, %6 : vector<256x512xbf16>
    %cst_5 = arith.constant 0.000000e+00 : bf16
    %8 = vector.broadcast %cst_5 : bf16 to vector<256x512xbf16>
    %9 = arith.maximumf %7, %8 : vector<256x512xbf16>
    %c0_6 = arith.constant 0 : index
    %c0_7 = arith.constant 0 : index
    %10 = vector.load %arg4[%c0_6, %c0_7] : memref<512x128xbf16, #tpu.memory_space<vmem>>, vector<512x128xbf16>
    %cst_8 = arith.constant dense<0.000000e+00> : vector<256x128xf32>
    %11 = tpu.matmul %9, %10, %cst_8 {dimension_numbers = #tpu.dot_dimension_numbers<[1], [0], [0], [1], [0, 0, 1, 1], [], []>} : vector<256x512xbf16>, vector<512x128xbf16>, vector<256x128xf32> -> vector<256x128xf32>
    %c0_9 = arith.constant 0 : index
    %c0_10 = arith.constant 0 : index
    %12 = vector.load %arg5[%c0_9, %c0_10] : memref<1x128xf32, #tpu.memory_space<vmem>>, vector<1x128xf32>
    %13 = vector.broadcast %12 : vector<1x128xf32> to vector<256x128xf32>
    %14 = arith.addf %11, %13 : vector<256x128xf32>
    %15 = arith.truncf %14 : vector<256x128xf32> to vector<256x128xbf16>
    %c0_11 = arith.constant 0 : index
    %c0_12 = arith.constant 0 : index
    %16 = vector.load %arg6[%c0_11, %c0_12] : memref<256x128xbf16, #tpu.memory_space<vmem>>, vector<256x128xbf16>
    tpu.vector_store %arg6[%c0_11, %c0_12], %15 {strides = array<i32>} : memref<256x128xbf16, #tpu.memory_space<vmem>>, vector<256x128xbf16>,
    return
  }
  func.func @transform_0(%arg0: i32) -> (i32, i32) {
    %c0_i32 = arith.constant 0 : i32
    %c0_i32_0 = arith.constant 0 : i32
    return %arg0, %c0_i32 : i32, i32
  }
  func.func @transform_1(%arg0: i32) -> (i32, i32) {
    %c0_i32 = arith.constant 0 : i32
    %c0_i32_0 = arith.constant 0 : i32
    %c0_i32_1 = arith.constant 0 : i32
    return %c0_i32, %c0_i32_0 : i32, i32
  }
  func.func @transform_2(%arg0: i32) -> (i32, i32) {
    %c0_i32 = arith.constant 0 : i32
    %c0_i32_0 = arith.constant 0 : i32
    %c0_i32_1 = arith.constant 0 : i32
    return %c0_i32, %c0_i32_0 : i32, i32
  }
  func.func @transform_3(%arg0: i32) -> (i32, i32) {
    %c0_i32 = arith.constant 0 : i32
    %c0_i32_0 = arith.constant 0 : i32
    %c0_i32_1 = arith.constant 0 : i32
    return %c0_i32, %c0_i32_0 : i32, i32
  }
  func.func @transform_4(%arg0: i32) -> (i32, i32) {
    %c0_i32 = arith.constant 0 : i32
    %c0_i32_0 = arith.constant 0 : i32
    %c0_i32_1 = arith.constant 0 : i32
    return %c0_i32, %c0_i32_0 : i32, i32
  }
  func.func @transform_5(%arg0: i32) -> (i32, i32) {
    %c0_i32 = arith.constant 0 : i32
    %c0_i32_0 = arith.constant 0 : i32
    return %arg0, %c0_i32 : i32, i32
  }
}

</mosaic_0001>

<bundles_post_ra>
// kernel: tpu_custom_call.1
= control target key start
LH: loop header
LB: loop body
LE: loop exit
PB: predicated region body
PF: predicated region fallthrough
CT: control target
= control target key end

     0   :  { %10 = vsyncpa [#allocation3], 0  ;;  %s2745_s0 = inlined_call_operand.hbm [shape: bf16[256,128], index: 0, kind: input, shape index: {}]   ;;  %s2746_s1 = inlined_call_operand.hbm [shape: bf16[128,512], index: 1, kind: input, shape index: {}]   ;;  %s2747_s2 = inlined_call_operand.vmem [shape: f32[1,512], index: 2, kind: input, shape index: {}]   ;;  %s2748_s3 = inlined_call_operand.hbm [shape: bf16[512,128], index: 3, kind: input, shape index: {}]   ;;  %s2749_s4 = inlined_call_operand.vmem [shape: f32[1,128], index: 4, kind: input, shape index: {}]   ;;  %s2750_s5 = inlined_call_operand.hbm [shape: bf16[256,128], index: 5, kind: output, shape index: {}]  }
   0x1   :  { %11 = vsyncpa [#allocation6], 0 }
   0x2   :  { %12 = vsyncpa [#allocation4], 0  ;;  %s2441_s18 = smov [#allocation5]   ;;  %s2347_s22 = scalar_lea.hbm %s2746_s1, 4096 }
   0x3   :  { %s30_s19 = sshll.u32 %s2441_s18, 4  ;;  %p2348_p0 = scmp.ne.s32.totalorder %s2746_s1, %s2347_s22  ;;  %s31_s19 = int_to_ptr.vmem [resolvable:$true] %s30_s19 }
   0x4   :  { %p2351_p1 = scmp.lt.u32.totalorder %s2347_s22, %s2746_s1 }
   0x6   :  { %p2353_p2 = pnand %p2351_p1, %p2348_p0 }
   0x8   :  { %2356 = shalt.err (!%p2353_p2)
}
   0x9   :  { %s2357_s27 = scalar_lea.vmem %s31_s19, 4096  ;;  %p2362_p4 = scmp.lt.s32.totalorder %s31_s19, %s31_s19 }
   0xa   :  { %p2358_p3 = scmp.ne.s32.totalorder %s31_s19, %s2357_s27  ;;  %p2363_p5 = scmp.lt.s32.totalorder %s2357_s27, %s2357_s27 }
   0xc   :  { %p2364_p6 = por %p2363_p5, %p2362_p4 }
   0xe   :  { %p2365_p7 = pnand %p2364_p6, %p2358_p3 }
  0x10   :  { %2368 = shalt.err (!%p2365_p7)
}
  0x11   :  { %s2442_s28 = smov 256   ;;  %s2443_s29 = smov 16  }
  0x12   :  { %36 = dma.hbm_to_vmem [thread:$0]  %s2746_s1, 4096, %s31_s19, [#allocation6], %s2442_s28, %s2442_s28, %s2443_s29  }
  0x13   :  { %s2444_s7 = smov [#allocation2]   ;;  %s2369_s11 = scalar_lea.hbm %s2745_s0, 2048 }
  0x14   :  { %s18_s8 = sshll.u32 %s2444_s7, 4  ;;  %p2370_p8 = scmp.ne.s32.totalorder %s2745_s0, %s2369_s11  ;;  %s19_s8 = int_to_ptr.vmem [resolvable:$true] %s18_s8 }
  0x15   :  { %p2373_p9 = scmp.lt.u32.totalorder %s2369_s11, %s2745_s0 }
  0x17   :  { %p2375_p10 = pnand %p2373_p9, %p2370_p8 }
  0x19   :  { %2378 = shalt.err (!%p2375_p10)
}
  0x1a   :  { %s2379_s16 = scalar_lea.vmem %s19_s8, 2048  ;;  %p2384_p12 = scmp.lt.s32.totalorder %s19_s8, %s19_s8 }
  0x1b   :  { %p2380_p11 = scmp.ne.s32.totalorder %s19_s8, %s2379_s16  ;;  %p2385_p13 = scmp.lt.s32.totalorder %s2379_s16, %s2379_s16 }
  0x1d   :  { %p2386_p0 = por %p2385_p13, %p2384_p12 }
  0x1f   :  { %p2387_p1 = pnand %p2386_p0, %p2380_p11 }
  0x21   :  { %2390 = shalt.err (!%p2387_p1)
}
  0x22   :  { %s2445_s1 = smov 64   ;;  %s2446_s17 = smov 4  }
  0x23   :  { %24 = dma.hbm_to_vmem [thread:$0]  %s2745_s0, 2048, %s19_s8, [#allocation3], %s2445_s1, %s2445_s1, %s2446_s17  }
  0x24   :  { %s2447_s20 = smov [#allocation7]   ;;  %s2391_s24 = scalar_lea.hbm %s2748_s3, 4096 }
  0x25   :  { %s44_s21 = sshll.u32 %s2447_s20, 4  ;;  %p2392_p2 = scmp.ne.s32.totalorder %s2748_s3, %s2391_s24  ;;  %s45_s21 = int_to_ptr.vmem [resolvable:$true] %s44_s21 }
  0x26   :  { %p2395_p3 = scmp.lt.u32.totalorder %s2391_s24, %s2748_s3 }
  0x28   :  { %p2397_p4 = pnand %p2395_p3, %p2392_p2 }
  0x2a   :  { %2400 = shalt.err (!%p2397_p4)
}
  0x2b   :  { %s2401_s29 = scalar_lea.vmem %s45_s21, 4096  ;;  %p2406_p6 = scmp.lt.s32.totalorder %s45_s21, %s45_s21 }
  0x2c   :  { %p2402_p5 = scmp.ne.s32.totalorder %s45_s21, %s2401_s29  ;;  %p2407_p7 = scmp.lt.s32.totalorder %s2401_s29, %s2401_s29 }
  0x2e   :  { %p2408_p8 = por %p2407_p7, %p2406_p6 }
  0x30   :  { %p2409_p9 = pnand %p2408_p8, %p2402_p5 }
  0x32   :  { %2412 = shalt.err (!%p2409_p9)
}
  0x33   :  { %50 = dma.hbm_to_vmem [thread:$0]  %s2748_s3, 4096, %s45_s21, [#allocation6], %s2445_s1, %s2445_s1, %s2446_s17  }
  0x34   :  { %2435 = dma.done.wait [#allocation3], 2048  }
  0x35   :  { %2436 = vsyncadd [#allocation3], 4294965248 }
  0x36   :  { %2437 = dma.done.wait [#allocation6], 8192  }
  0x37   :  { %2438 = vsyncadd [#allocation6], 4294959104  ;;  %v2448_v0 = vmov 0   ;;  %v2251_v1 = vld [vmem:[#allocation5 + $0x4] ss:$16 sps:$4 sm:$0xff]   ;;  %v2300_v38 = vld [vmem:[#allocation2 + $0x8] sm:$0xff]  }
  0x38   :  { %415 = vmatprep.mubr.bf16.mxu0 %v2448_v0  ;;  %608 = vmatprep.mubr.bf16.mxu1 %v2448_v0  ;;  %v2253_v2 = vld [vmem:[#allocation5 + $0xc] ss:$16 sps:$4 sm:$0xff]   ;;  %v2255_v3 = vld [vmem:[#allocation5] ss:$16 sps:$4 sm:$0xff]   ;;  %v2256_v4 = vld [vmem:[#allocation5 + $0x8] ss:$16 sps:$4 sm:$0xff]  }
  0x39   :  { %383 = vmatprep.subr.bf16.mxu0 %v2251_v1  ;;  %576 = vmatprep.subr.bf16.mxu1 %v2253_v2  ;;  %v2257_v5 = vld [vmem:[#allocation5 + $0x24] ss:$16 sps:$4 sm:$0xff]   ;;  %v2259_v6 = vld [vmem:[#allocation5 + $0x2c] ss:$16 sps:$4 sm:$0xff]   ;;  %v2261_v7 = vld [vmem:[#allocation5 + $0x20] ss:$16 sps:$4 sm:$0xff]  }
  0x3a   :  { %384 = vmatpush1.bf16.msra.mxu0 %v2255_v3  ;;  %577 = vmatpush1.bf16.msra.mxu1 %v2256_v4  ;;  %v2262_v8 = vld [vmem:[#allocation5 + $0x28] ss:$16 sps:$4 sm:$0xff]   ;;  %v2263_v9 = vld [vmem:[#allocation5 + $0x44] ss:$16 sps:$4 sm:$0xff]   ;;  %v2265_v10 = vld [vmem:[#allocation5 + $0x4c] ss:$16 sps:$4 sm:$0xff]  }
  0x3b   :  { %385 = vmatprep.subr.bf16.mxu0 %v2257_v5  ;;  %578 = vmatprep.subr.bf16.mxu1 %v2259_v6  ;;  %v2267_v11 = vld [vmem:[#allocation5 + $0x40] ss:$16 sps:$4 sm:$0xff]   ;;  %v2268_v12 = vld [vmem:[#allocation5 + $0x48] ss:$16 sps:$4 sm:$0xff]   ;;  %v2269_v13 = vld [vmem:[#allocation5 + $0x64] ss:$16 sps:$4 sm:$0xff]  }
  0x3c   :  { %v2271_v14 = vld [vmem:[#allocation5 + $0x6c] ss:$16 sps:$4 sm:$0xff]   ;;  %v2273_v15 = vld [vmem:[#allocation5 + $0x60] ss:$16 sps:$4 sm:$0xff]   ;;  %v2274_v16 = vld [vmem:[#allocation5 + $0x68] ss:$16 sps:$4 sm:$0xff]  }
  0x3d   :  { %v2275_v17 = vld [vmem:[#allocation5 + $0x84] ss:$16 sps:$4 sm:$0xff]   ;;  %v2277_v18 = vld [vmem:[#allocation5 + $0x8c] ss:$16 sps:$4 sm:$0xff]   ;;  %v2279_v19 = vld [vmem:[#allocation5 + $0x80] ss:$16 sps:$4 sm:$0xff]  }
  0x3e   :  { %386 = vmatpush1.bf16.msra.mxu0 %v2261_v7  ;;  %579 = vmatpush1.bf16.msra.mxu1 %v2262_v8  ;;  %v2280_v20 = vld [vmem:[#allocation5 + $0x88] ss:$16 sps:$4 sm:$0xff]   ;;  %v2281_v21 = vld [vmem:[#allocation5 + $0xa4] ss:$16 sps:$4 sm:$0xff]   ;;  %v2283_v22 = vld [vmem:[#allocation5 + $0xac] ss:$16 sps:$4 sm:$0xff]  }
  0x3f   :  { %387 = vmatprep.subr.bf16.mxu0 %v2263_v9  ;;  %580 = vmatprep.subr.bf16.mxu1 %v2265_v10  ;;  %v2285_v23 = vld [vmem:[#allocation5 + $0xa0] ss:$16 sps:$4 sm:$0xff]   ;;  %v2286_v24 = vld [vmem:[#allocation5 + $0xa8] ss:$16 sps:$4 sm:$0xff]   ;;  %v2287_v25 = vld [vmem:[#allocation5 + $0xc4] ss:$16 sps:$4 sm:$0xff]  }
  0x40   :  { %v2289_v26 = vld [vmem:[#allocation5 + $0xcc] ss:$16 sps:$4 sm:$0xff]   ;;  %v2291_v27 = vld [vmem:[#allocation5 + $0xc0] ss:$16 sps:$4 sm:$0xff]   ;;  %v2292_v28 = vld [vmem:[#allocation5 + $0xc8] ss:$16 sps:$4 sm:$0xff]  }
  0x41   :  { %v2293_v29 = vld [vmem:[#allocation5 + $0xe4] ss:$16 sps:$4 sm:$0xff]   ;;  %v2295_v30 = vld [vmem:[#allocation5 + $0xec] ss:$16 sps:$4 sm:$0xff]   ;;  %v2297_v31 = vld [vmem:[#allocation5 + $0xe0] ss:$16 sps:$4 sm:$0xff]  }
  0x42   :  { %388 = vmatpush1.bf16.msra.mxu0 %v2267_v11  ;;  %581 = vmatpush1.bf16.msra.mxu1 %v2268_v12  ;;  %v2298_v32 = vld [vmem:[#allocation5 + $0xe8] ss:$16 sps:$4 sm:$0xff]   ;;  %v2299_v33 = vld [vmem:[#allocation2] sm:$0xff]   ;;  %v2301_v43 = vld [vmem:[#allocation2 + $0x10] sm:$0xff]  }
  0x43   :  { %389 = vmatprep.subr.bf16.mxu0 %v2269_v13  ;;  %582 = vmatprep.subr.bf16.mxu1 %v2271_v14  ;;  %v2311_v34 = vld [vmem:[#allocation7 + $0x40] sm:$0xff]   ;;  %v2317_v39 = vld [vmem:[#allocation7 + $0x48] sm:$0xff]   ;;  %v2323_v44 = vld [vmem:[#allocation7 + $0x50] sm:$0xff]  }
  0x44   :  { %v2312_v35 = vld [vmem:[#allocation7] sm:$0xff]   ;;  %v2318_v40 = vld [vmem:[#allocation7 + $0x8] sm:$0xff]   ;;  %v2324_v45 = vld [vmem:[#allocation7 + $0x10] sm:$0xff]  }
  0x45   :  { %v2313_v36 = vld [vmem:[#allocation7 + $0xc0] sm:$0xff]   ;;  %v2319_v41 = vld [vmem:[#allocation7 + $0xc8] sm:$0xff]   ;;  %v2325_v46 = vld [vmem:[#allocation7 + $0xd0] sm:$0xff]  }
  0x46   :  { %390 = vmatpush1.bf16.msra.mxu0 %v2273_v15  ;;  %583 = vmatpush1.bf16.msra.mxu1 %v2274_v16  ;;  %v2315_v37 = vld [vmem:[#allocation7 + $0x80] sm:$0xff]   ;;  %v2321_v42 = vld [vmem:[#allocation7 + $0x88] sm:$0xff]   ;;  %v2326_v47 = vld [vmem:[#allocation7 + $0x90] sm:$0xff]  }
  0x47   :  { %391 = vmatprep.subr.bf16.mxu0 %v2275_v17  ;;  %584 = vmatprep.subr.bf16.mxu1 %v2277_v18  ;;  %v2327_v48 = vld [vmem:[#allocation7 + $0x58] sm:$0xff]   ;;  %v2331_v53 = vld [vmem:[#allocation7 + $0x60] sm:$0xff]   ;;  %v2335_v57 = vld [vmem:[#allocation7 + $0x68] sm:$0xff]   ;;  %v835_v18 = vlaneseq }
  0x48   :  { %v2328_v49 = vld [vmem:[#allocation7 + $0x18] sm:$0xff]   ;;  %v2332_v54 = vld [vmem:[#allocation7 + $0x20] sm:$0xff]   ;;  %v2336_v58 = vld [vmem:[#allocation7 + $0x28] sm:$0xff]  }
  0x49   :  { %v2329_v50 = vld [vmem:[#allocation7 + $0xd8] sm:$0xff]   ;;  %v2333_v55 = vld [vmem:[#allocation7 + $0xe0] sm:$0xff]   ;;  %v2337_v59 = vld [vmem:[#allocation7 + $0xe8] sm:$0xff]  }
  0x4a   :  { %392 = vmatpush1.bf16.msra.mxu0 %v2279_v19  ;;  %585 = vmatpush1.bf16.msra.mxu1 %v2280_v20  ;;  %v2302_v51 = vld [vmem:[#allocation2 + $0x18] sm:$0xff]   ;;  %v2334_v56 = vld [vmem:[#allocation7 + $0xa0] sm:$0xff]   ;;  %v2338_v61 = vld [vmem:[#allocation7 + $0xa8] sm:$0xff]   ;;  %v836_v19 = vshrl.u32 %v835_v18, 7 }
  0x4b   :  { %393 = vmatprep.subr.bf16.mxu0 %v2281_v21  ;;  %586 = vmatprep.subr.bf16.mxu1 %v2283_v22  ;;  %v2330_v52 = vld [vmem:[#allocation7 + $0x98] sm:$0xff]   ;;  %v2303_v60 = vld [vmem:[#allocation2 + $0x20] sm:$0xff]   ;;  %v2339_v62 = vld [vmem:[#allocation7 + $0x70] sm:$0xff]  }
  0x4c   :  { %v2340_v63 = vld [vmem:[#allocation7 + $0x30] sm:$0xff]   ;;  %v2343_v3 = vld [vmem:[#allocation7 + $0x78] sm:$0xff]   ;;  %v2304_v7 = vld [vmem:[#allocation2 + $0x28] sm:$0xff]   ;;  %v837_v20 = vsub.s32 0, %v836_v19  ;;  %v845_v21 = vsub.s32 2, %v836_v19 }
  0x4d   :  { %v2341_v1 = vld [vmem:[#allocation7 + $0xf0] sm:$0xff]   ;;  %v2344_v4 = vld [vmem:[#allocation7 + $0x38] sm:$0xff]   ;;  %v2307_v10 = vld [vmem:[#allocation2 + $0x40] sm:$0xff]  }
  0x4e   :  { %394 = vmatpush1.bf16.msra.mxu0 %v2285_v23  ;;  %587 = vmatpush1.bf16.msra.mxu1 %v2286_v24  ;;  %v2342_v2 = vld [vmem:[#allocation7 + $0xb0] sm:$0xff]   ;;  %v2345_v5 = vld [vmem:[#allocation7 + $0xf8] sm:$0xff]   ;;  %v2308_v11 = vld [vmem:[#allocation2 + $0x48] sm:$0xff]   ;;  %v841_v23 = vsub.s32 1, %v836_v19  ;;  %v849_v24 = vsub.s32 3, %v836_v19 }
  0x4f   :  { %395 = vmatprep.subr.bf16.mxu0 %v2287_v25  ;;  %588 = vmatprep.subr.bf16.mxu1 %v2289_v26  ;;  %v2346_v6 = vld [vmem:[#allocation7 + $0xb8] sm:$0xff]   ;;  %v2305_v8 = vld [vmem:[#allocation2 + $0x30] sm:$0xff]   ;;  %v2314_v14 = vld [vmem:[#allocation2 + $0x60] sm:$0xff]  }
  0x50   :  { %v2306_v9 = vld [vmem:[#allocation2 + $0x38] sm:$0xff]   ;;  %v2309_v12 = vld [vmem:[#allocation2 + $0x50] sm:$0xff]   ;;  %v2316_v15 = vld [vmem:[#allocation2 + $0x68] sm:$0xff]  }
  0x51   :  { %v2310_v13 = vld [vmem:[#allocation2 + $0x58] sm:$0xff]   ;;  %v2320_v16 = vld [vmem:[#allocation2 + $0x70] sm:$0xff]   ;;  %v833_v22 = vld [vmem:[%s2747_s2] sm:$0xf] }
  0x52   :  { %396 = vmatpush1.bf16.msra.mxu0 %v2291_v27  ;;  %589 = vmatpush1.bf16.msra.mxu1 %v2292_v28  ;;  %v2322_v17 = vld [vmem:[#allocation2 + $0x78] sm:$0xff]   ;;  %v838_v25 = vrot.slane %v833_v22, %v837_v20  ;;  %v846_v26 = vrot.slane %v833_v22, %v845_v21  ;;  %v842_v27 = vrot.slane %v833_v22, %v841_v23 }
  0x53   :  { %397 = vmatprep.subr.bf16.mxu0 %v2293_v29  ;;  %590 = vmatprep.subr.bf16.mxu1 %v2295_v30  ;;  %v850_v28 = vrot.slane %v833_v22, %v849_v24 }
  0x54   :  { %v855_v29 = vpack.c.bf16 %v838_v25, %v838_v25  ;;  %v857_v30 = vpack.c.bf16 %v846_v26, %v846_v26 }
  0x56   :  { %398 = vmatpush1.bf16.msra.mxu0 %v2297_v31  ;;  %591 = vmatpush1.bf16.msra.mxu1 %v2298_v32  ;;  %v856_v31 = vpack.c.bf16 %v842_v27, %v842_v27  ;;  %v858_v32 = vpack.c.bf16 %v850_v28, %v850_v28 }
  0x57   :  { %2018 = vmatprep.subr.bf16.mxu0 %v2311_v34  ;;  %2130 = vmatprep.subr.bf16.mxu1 %v2313_v36  ;;  %v874_v34 = vpack.i.b16 %v857_v30, %v857_v30 }
  0x58   :  { %v881_v36 = vpack.i.b16 %v858_v32, %v858_v32 }
  0x59   :  { %416 = vmatmul.mubr.bf16.vlgmr.msra.gmra.mrb[0].mxu0 %v2299_v33  ;;  %609 = vmatmul.mubr.bf16.vlgmr.msra.gmra.mrb[0].mxu1 %v2299_v33  ;;  %v860_v33 = vpack.i.b16 %v855_v29, %v855_v29 }
  0x5a   :  { %425 = vmatprep.mubr.bf16.mxu0 %v2448_v0  ;;  %618 = vmatprep.mubr.bf16.mxu1 %v2448_v0 }
  0x5b   :  { %2019 = vmatpush3.bf16.msra.mxu0 %v2312_v35  ;;  %2131 = vmatpush3.bf16.msra.mxu1 %v2315_v37  ;;  %v867_v35 = vpack.i.b16 %v856_v31, %v856_v31 }
  0x5c   :  { %2020 = vmatprep.subr.bf16.mxu0 %v2317_v39  ;;  %2132 = vmatprep.subr.bf16.mxu1 %v2319_v41  ;;  %v2557_v41 = vrot.slane %v860_v33, %v837_v20 }
  0x5f   :  { %2021 = vmatpush3.bf16.msra.mxu0 %v2318_v40  ;;  %2133 = vmatpush3.bf16.msra.mxu1 %v2321_v42  ;;  %v2559_v42 = vrot.slane %v874_v34, %v837_v20 }
  0x60   :  { %2022 = vmatprep.subr.bf16.mxu0 %v2323_v44  ;;  %2134 = vmatprep.subr.bf16.mxu1 %v2325_v46  ;;  %v2563_v46 = vrot.slane %v881_v36, %v837_v20 }
  0x61   :  { %426 = vmatmul.mubr.bf16.gmra.mrb[4].mxu0 %v2300_v38  ;;  %619 = vmatmul.mubr.bf16.gmra.mrb[4].mxu1 %v2300_v38 }
  0x62   :  { %435 = vmatprep.mubr.bf16.mxu0 %v2448_v0  ;;  %628 = vmatprep.mubr.bf16.mxu1 %v2448_v0 }
  0x63   :  { %2023 = vmatpush3.bf16.msra.mxu0 %v2324_v45  ;;  %2135 = vmatpush3.bf16.msra.mxu1 %v2326_v47  ;;  %v2561_v45 = vrot.slane %v867_v35, %v837_v20 }
  0x64   :  { %2024 = vmatprep.subr.bf16.mxu0 %v2327_v48  ;;  %2136 = vmatprep.subr.bf16.mxu1 %v2329_v50 }
  0x67   :  { %2025 = vmatpush3.bf16.msra.mxu0 %v2328_v49  ;;  %2137 = vmatpush3.bf16.msra.mxu1 %v2330_v52 }
  0x68   :  { %2026 = vmatprep.subr.bf16.mxu0 %v2331_v53  ;;  %2138 = vmatprep.subr.bf16.mxu1 %v2333_v55 }
  0x69   :  { %436 = vmatmul.mubr.bf16.gmra.mrb[8].mxu0 %v2301_v43  ;;  %629 = vmatmul.mubr.bf16.gmra.mrb[8].mxu1 %v2301_v43 }
  0x6a   :  { %445 = vmatprep.mubr.bf16.mxu0 %v2448_v0  ;;  %638 = vmatprep.mubr.bf16.mxu1 %v2448_v0 }
  0x6b   :  { %2027 = vmatpush3.bf16.msra.mxu0 %v2332_v54  ;;  %2139 = vmatpush3.bf16.msra.mxu1 %v2334_v56 }
  0x6c   :  { %2028 = vmatprep.subr.bf16.mxu0 %v2335_v57  ;;  %2140 = vmatprep.subr.bf16.mxu1 %v2337_v59 }
  0x6f   :  { %2029 = vmatpush3.bf16.msra.mxu0 %v2336_v58  ;;  %2141 = vmatpush3.bf16.msra.mxu1 %v2338_v61 }
  0x70   :  { %2030 = vmatprep.subr.bf16.mxu0 %v2339_v62  ;;  %2142 = vmatprep.subr.bf16.mxu1 %v2341_v1 }
  0x71   :  { %446 = vmatmul.mubr.bf16.gmra.mrb[12].mxu0 %v2302_v51  ;;  %639 = vmatmul.mubr.bf16.gmra.mrb[12].mxu1 %v2302_v51 }
  0x72   :  { %455 = vmatprep.mubr.bf16.mxu0 %v2448_v0  ;;  %648 = vmatprep.mubr.bf16.mxu1 %v2448_v0 }
  0x73   :  { %2031 = vmatpush3.bf16.msra.mxu0 %v2340_v63  ;;  %2143 = vmatpush3.bf16.msra.mxu1 %v2342_v2 }
  0x74   :  { %2032 = vmatprep.subr.bf16.mxu0 %v2343_v3  ;;  %2144 = vmatprep.subr.bf16.mxu1 %v2345_v5 }
  0x77   :  { %2033 = vmatpush3.bf16.msra.mxu0 %v2344_v4  ;;  %2145 = vmatpush3.bf16.msra.mxu1 %v2346_v6 }
  0x79   :  { %456 = vmatmul.mubr.bf16.gmra.mrb[16].mxu0 %v2303_v60  ;;  %649 = vmatmul.mubr.bf16.gmra.mrb[16].mxu1 %v2303_v60 }
  0x7a   :  { %465 = vmatprep.mubr.bf16.mxu0 %v2448_v0  ;;  %658 = vmatprep.mubr.bf16.mxu1 %v2448_v0 }
  0x81   :  { %466 = vmatmul.mubr.bf16.gmra.mrb[20].mxu0 %v2304_v7  ;;  %659 = vmatmul.mubr.bf16.gmra.mrb[20].mxu1 %v2304_v7 }
  0x82   :  { %475 = vmatprep.mubr.bf16.mxu0 %v2448_v0  ;;  %668 = vmatprep.mubr.bf16.mxu1 %v2448_v0 }
  0x89   :  { %476 = vmatmul.mubr.bf16.gmra.mrb[24].mxu0 %v2305_v8  ;;  %669 = vmatmul.mubr.bf16.gmra.mrb[24].mxu1 %v2305_v8 }
  0x8a   :  { %485 = vmatprep.mubr.bf16.mxu0 %v2448_v0  ;;  %678 = vmatprep.mubr.bf16.mxu1 %v2448_v0 }
  0x91   :  { %486 = vmatmul.mubr.bf16.gmra.mrb[28].mxu0 %v2306_v9  ;;  %679 = vmatmul.mubr.bf16.gmra.mrb[28].mxu1 %v2306_v9 }
  0x92   :  { %495 = vmatprep.mubr.bf16.mxu0 %v2448_v0  ;;  %688 = vmatprep.mubr.bf16.mxu1 %v2448_v0 }
  0x99   :  { %496 = vmatmul.mubr.bf16.gmra.mrb[32].mxu0 %v2307_v10  ;;  %689 = vmatmul.mubr.bf16.gmra.mrb[32].mxu1 %v2307_v10 }
  0x9a   :  { %505 = vmatprep.mubr.bf16.mxu0 %v2448_v0  ;;  %698 = vmatprep.mubr.bf16.mxu1 %v2448_v0 }
  0xa1   :  { %506 = vmatmul.mubr.bf16.gmra.mrb[36].mxu0 %v2308_v11  ;;  %699 = vmatmul.mubr.bf16.gmra.mrb[36].mxu1 %v2308_v11 }
  0xa2   :  { %515 = vmatprep.mubr.bf16.mxu0 %v2448_v0  ;;  %708 = vmatprep.mubr.bf16.mxu1 %v2448_v0 }
  0xa9   :  { %516 = vmatmul.mubr.bf16.gmra.mrb[40].mxu0 %v2309_v12  ;;  %709 = vmatmul.mubr.bf16.gmra.mrb[40].mxu1 %v2309_v12 }
  0xaa   :  { %525 = vmatprep.mubr.bf16.mxu0 %v2448_v0  ;;  %718 = vmatprep.mubr.bf16.mxu1 %v2448_v0 }
  0xb1   :  { %526 = vmatmul.mubr.bf16.gmra.mrb[44].mxu0 %v2310_v13  ;;  %719 = vmatmul.mubr.bf16.gmra.mrb[44].mxu1 %v2310_v13 }
  0xb2   :  { %535 = vmatprep.mubr.bf16.mxu0 %v2448_v0  ;;  %728 = vmatprep.mubr.bf16.mxu1 %v2448_v0 }
  0xb9   :  { %536 = vmatmul.mubr.bf16.gmra.mrb[48].mxu0 %v2314_v14  ;;  %729 = vmatmul.mubr.bf16.gmra.mrb[48].mxu1 %v2314_v14 }
  0xba   :  { %545 = vmatprep.mubr.bf16.mxu0 %v2448_v0  ;;  %738 = vmatprep.mubr.bf16.mxu1 %v2448_v0 }
  0xc1   :  { %546 = vmatmul.mubr.bf16.gmra.mrb[52].mxu0 %v2316_v15  ;;  %739 = vmatmul.mubr.bf16.gmra.mrb[52].mxu1 %v2316_v15 }
  0xc2   :  { %555 = vmatprep.mubr.bf16.mxu0 %v2448_v0  ;;  %748 = vmatprep.mubr.bf16.mxu1 %v2448_v0 }
  0xc9   :  { %556 = vmatmul.mubr.bf16.gmra.mrb[56].mxu0 %v2320_v16  ;;  %749 = vmatmul.mubr.bf16.gmra.mrb[56].mxu1 %v2320_v16 }
  0xca   :  { %565 = vmatprep.mubr.bf16.mxu0 %v2448_v0  ;;  %758 = vmatprep.mubr.bf16.mxu1 %v2448_v0 }
  0xd1   :  { %566 = vmatmul.mubr.bf16.gmra.mrb[60].mxu0 %v2322_v17  ;;  %759 = vmatmul.mubr.bf16.gmra.mrb[60].mxu1 %v2322_v17 }
 0x12c   :  { %v417_v37 = vpop.f32.mrb[0].mxu0  ;;  %v610_v38 = vpop.f32.mrb[0].mxu1 }
 0x12d   :  { %v419_v39 = vpop.f32.mrb[1].mxu0  ;;  %v612_v40 = vpop.f32.mrb[1].mxu1 }
 0x12e   :  { %v421_v43 = vpop.f32.mrb[2].mxu0  ;;  %v614_v44 = vpop.f32.mrb[2].mxu1 }
 0x12f   :  { %v769_v47 = vpack.c.bf16 %v421_v43, %v417_v37  ;;  %v771_v48 = vpack.c.bf16 %v614_v44, %v610_v38  ;;  %v423_v49 = vpop.f32.mrb[3].mxu0  ;;  %v616_v50 = vpop.f32.mrb[3].mxu1 }
 0x130   :  { %v770_v51 = vpack.c.bf16 %v423_v49, %v419_v39  ;;  %v772_v52 = vpack.c.bf16 %v616_v50, %v612_v40 }
 0x131   :  { %v887_v53 = vadd.bf16 %v2557_v41, %v769_v47  ;;  %v889_v54 = vadd.bf16 %v2559_v42, %v771_v48 }
 0x132   :  { %v888_v55 = vadd.bf16 %v2561_v45, %v770_v51  ;;  %v890_v56 = vadd.bf16 %v2563_v46, %v772_v52 }
 0x133   :  { %v951_v61 = vmax.bf16 %v2448_v0, %v887_v53  ;;  %v953_v62 = vmax.bf16 %v2448_v0, %v889_v54 }
 0x134   :  { %v427_v57 = vpop.f32.mrb[4].mxu0  ;;  %v620_v58 = vpop.f32.mrb[4].mxu1  ;;  %v952_v59 = vmax.bf16 %v2448_v0, %v888_v55  ;;  %v954_v60 = vmax.bf16 %v2448_v0, %v890_v56 }
 0x135   :  { %v429_v63 = vpop.f32.mrb[5].mxu0  ;;  %v622_v1 = vpop.f32.mrb[5].mxu1 }
 0x136   :  { %v431_v2 = vpop.f32.mrb[6].mxu0  ;;  %v624_v3 = vpop.f32.mrb[6].mxu1  ;;  %1310 = vmatprep.mubr.bf16.mxu0 %v952_v59  ;;  %1471 = vmatprep.mubr.bf16.mxu1 %v954_v60 }
 0x137   :  { %v773_v4 = vpack.c.bf16 %v431_v2, %v427_v57  ;;  %v775_v5 = vpack.c.bf16 %v624_v3, %v620_v58  ;;  %v433_v6 = vpop.f32.mrb[7].mxu0  ;;  %v626_v7 = vpop.f32.mrb[7].mxu1  ;;  %1311 = vmatmul.mubr.bf16.vlgmr.msra.gmra.mrb[64].mxu0 %v951_v61  ;;  %1472 = vmatmul.mubr.bf16.vlgmr.msra.gmra.mrb[64].mxu1 %v953_v62 }
 0x138   :  { %v774_v8 = vpack.c.bf16 %v433_v6, %v429_v63  ;;  %v776_v9 = vpack.c.bf16 %v626_v7, %v622_v1 }
 0x139   :  { %v891_v10 = vadd.bf16 %v2557_v41, %v773_v4  ;;  %v893_v11 = vadd.bf16 %v2559_v42, %v775_v5 }
 0x13a   :  { %v892_v12 = vadd.bf16 %v2561_v45, %v774_v8  ;;  %v894_v13 = vadd.bf16 %v2563_v46, %v776_v9 }
 0x13b   :  { %v955_v20 = vmax.bf16 %v2448_v0, %v891_v10  ;;  %v957_v21 = vmax.bf16 %v2448_v0, %v893_v11 }
 0x13c   :  { %v437_v14 = vpop.f32.mrb[8].mxu0  ;;  %v630_v15 = vpop.f32.mrb[8].mxu1  ;;  %v956_v16 = vmax.bf16 %v2448_v0, %v892_v12  ;;  %v958_v17 = vmax.bf16 %v2448_v0, %v894_v13 }
 0x13d   :  { %v439_v18 = vpop.f32.mrb[9].mxu0  ;;  %v632_v19 = vpop.f32.mrb[9].mxu1 }
 0x13e   :  { %v441_v22 = vpop.f32.mrb[10].mxu0  ;;  %v634_v23 = vpop.f32.mrb[10].mxu1  ;;  %1318 = vmatprep.mubr.bf16.mxu0 %v956_v16  ;;  %1479 = vmatprep.mubr.bf16.mxu1 %v958_v17 }
 0x13f   :  { %v777_v24 = vpack.c.bf16 %v441_v22, %v437_v14  ;;  %v779_v25 = vpack.c.bf16 %v634_v23, %v630_v15  ;;  %v443_v26 = vpop.f32.mrb[11].mxu0  ;;  %v636_v27 = vpop.f32.mrb[11].mxu1  ;;  %1319 = vmatmul.mubr.bf16.gmra.mrb[68].mxu0 %v955_v20  ;;  %1480 = vmatmul.mubr.bf16.gmra.mrb[68].mxu1 %v957_v21 }
 0x140   :  { %v778_v28 = vpack.c.bf16 %v443_v26, %v439_v18  ;;  %v780_v29 = vpack.c.bf16 %v636_v27, %v632_v19 }
 0x141   :  { %v895_v30 = vadd.bf16 %v2557_v41, %v777_v24  ;;  %v897_v31 = vadd.bf16 %v2559_v42, %v779_v25 }
 0x142   :  { %v896_v32 = vadd.bf16 %v2561_v45, %v778_v28  ;;  %v898_v33 = vadd.bf16 %v2563_v46, %v780_v29 }
 0x143   :  { %v959_v40 = vmax.bf16 %v2448_v0, %v895_v30  ;;  %v961_v43 = vmax.bf16 %v2448_v0, %v897_v31 }
 0x144   :  { %v447_v34 = vpop.f32.mrb[12].mxu0  ;;  %v640_v35 = vpop.f32.mrb[12].mxu1  ;;  %v960_v36 = vmax.bf16 %v2448_v0, %v896_v32  ;;  %v962_v37 = vmax.bf16 %v2448_v0, %v898_v33 }
 0x145   :  { %v449_v38 = vpop.f32.mrb[13].mxu0  ;;  %v642_v39 = vpop.f32.mrb[13].mxu1 }
 0x146   :  { %v451_v44 = vpop.f32.mrb[14].mxu0  ;;  %v644_v47 = vpop.f32.mrb[14].mxu1  ;;  %1326 = vmatprep.mubr.bf16.mxu0 %v960_v36  ;;  %1487 = vmatprep.mubr.bf16.mxu1 %v962_v37 }
 0x147   :  { %v781_v48 = vpack.c.bf16 %v451_v44, %v447_v34  ;;  %v783_v49 = vpack.c.bf16 %v644_v47, %v640_v35  ;;  %v453_v50 = vpop.f32.mrb[15].mxu0  ;;  %v646_v51 = vpop.f32.mrb[15].mxu1  ;;  %1327 = vmatmul.mubr.bf16.gmra.mrb[72].mxu0 %v959_v40  ;;  %1488 = vmatmul.mubr.bf16.gmra.mrb[72].mxu1 %v961_v43 }
 0x148   :  { %v782_v52 = vpack.c.bf16 %v453_v50, %v449_v38  ;;  %v784_v53 = vpack.c.bf16 %v646_v51, %v642_v39 }
 0x149   :  { %v899_v54 = vadd.bf16 %v2557_v41, %v781_v48  ;;  %v901_v55 = vadd.bf16 %v2559_v42, %v783_v49 }
 0x14a   :  { %v900_v56 = vadd.bf16 %v2561_v45, %v782_v52  ;;  %v902_v57 = vadd.bf16 %v2563_v46, %v784_v53 }
 0x14b   :  { %v963_v1 = vmax.bf16 %v2448_v0, %v899_v54  ;;  %v965_v2 = vmax.bf16 %v2448_v0, %v901_v55 }
 0x14c   :  { %v457_v58 = vpop.f32.mrb[16].mxu0  ;;  %v650_v59 = vpop.f32.mrb[16].mxu1  ;;  %v964_v60 = vmax.bf16 %v2448_v0, %v900_v56  ;;  %v966_v61 = vmax.bf16 %v2448_v0, %v902_v57 }
 0x14d   :  { %v459_v62 = vpop.f32.mrb[17].mxu0  ;;  %v652_v63 = vpop.f32.mrb[17].mxu1 }
 0x14e   :  { %v461_v3 = vpop.f32.mrb[18].mxu0  ;;  %v654_v4 = vpop.f32.mrb[18].mxu1  ;;  %1334 = vmatprep.mubr.bf16.mxu0 %v964_v60  ;;  %1495 = vmatprep.mubr.bf16.mxu1 %v966_v61 }
 0x14f   :  { %v785_v5 = vpack.c.bf16 %v461_v3, %v457_v58  ;;  %v787_v6 = vpack.c.bf16 %v654_v4, %v650_v59  ;;  %v463_v7 = vpop.f32.mrb[19].mxu0  ;;  %v656_v8 = vpop.f32.mrb[19].mxu1  ;;  %1335 = vmatmul.mubr.bf16.gmra.mrb[76].mxu0 %v963_v1  ;;  %1496 = vmatmul.mubr.bf16.gmra.mrb[76].mxu1 %v965_v2 }
 0x150   :  { %v786_v9 = vpack.c.bf16 %v463_v7, %v459_v62  ;;  %v788_v10 = vpack.c.bf16 %v656_v8, %v652_v63 }
 0x151   :  { %v903_v11 = vadd.bf16 %v2557_v41, %v785_v5  ;;  %v905_v12 = vadd.bf16 %v2559_v42, %v787_v6 }
 0x152   :  { %v904_v13 = vadd.bf16 %v2561_v45, %v786_v9  ;;  %v906_v14 = vadd.bf16 %v2563_v46, %v788_v10 }
 0x153   :  { %v967_v21 = vmax.bf16 %v2448_v0, %v903_v11  ;;  %v969_v22 = vmax.bf16 %v2448_v0, %v905_v12 }
 0x154   :  { %v467_v15 = vpop.f32.mrb[20].mxu0  ;;  %v660_v16 = vpop.f32.mrb[20].mxu1  ;;  %v968_v17 = vmax.bf16 %v2448_v0, %v904_v13  ;;  %v970_v18 = vmax.bf16 %v2448_v0, %v906_v14 }
 0x155   :  { %v469_v19 = vpop.f32.mrb[21].mxu0  ;;  %v662_v20 = vpop.f32.mrb[21].mxu1 }
 0x156   :  { %v471_v23 = vpop.f32.mrb[22].mxu0  ;;  %v664_v24 = vpop.f32.mrb[22].mxu1  ;;  %1342 = vmatprep.mubr.bf16.mxu0 %v968_v17  ;;  %1503 = vmatprep.mubr.bf16.mxu1 %v970_v18 }
 0x157   :  { %v789_v25 = vpack.c.bf16 %v471_v23, %v467_v15  ;;  %v791_v26 = vpack.c.bf16 %v664_v24, %v660_v16  ;;  %v473_v27 = vpop.f32.mrb[23].mxu0  ;;  %v666_v28 = vpop.f32.mrb[23].mxu1  ;;  %1343 = vmatmul.mubr.bf16.gmra.mrb[80].mxu0 %v967_v21  ;;  %1504 = vmatmul.mubr.bf16.gmra.mrb[80].mxu1 %v969_v22 }
 0x158   :  { %v790_v29 = vpack.c.bf16 %v473_v27, %v469_v19  ;;  %v792_v30 = vpack.c.bf16 %v666_v28, %v662_v20 }
 0x159   :  { %v907_v31 = vadd.bf16 %v2557_v41, %v789_v25  ;;  %v909_v32 = vadd.bf16 %v2559_v42, %v791_v26 }
 0x15a   :  { %v908_v33 = vadd.bf16 %v2561_v45, %v790_v29  ;;  %v910_v34 = vadd.bf16 %v2563_v46, %v792_v30 }
 0x15b   :  { %v971_v43 = vmax.bf16 %v2448_v0, %v907_v31  ;;  %v973_v44 = vmax.bf16 %v2448_v0, %v909_v32 }
 0x15c   :  { %v477_v35 = vpop.f32.mrb[24].mxu0  ;;  %v670_v36 = vpop.f32.mrb[24].mxu1  ;;  %v972_v37 = vmax.bf16 %v2448_v0, %v908_v33  ;;  %v974_v38 = vmax.bf16 %v2448_v0, %v910_v34 }
 0x15d   :  { %v479_v39 = vpop.f32.mrb[25].mxu0  ;;  %v672_v40 = vpop.f32.mrb[25].mxu1 }
 0x15e   :  { %v481_v47 = vpop.f32.mrb[26].mxu0  ;;  %v674_v48 = vpop.f32.mrb[26].mxu1  ;;  %1350 = vmatprep.mubr.bf16.mxu0 %v972_v37  ;;  %1511 = vmatprep.mubr.bf16.mxu1 %v974_v38 }
 0x15f   :  { %v793_v49 = vpack.c.bf16 %v481_v47, %v477_v35  ;;  %v795_v50 = vpack.c.bf16 %v674_v48, %v670_v36  ;;  %v483_v51 = vpop.f32.mrb[27].mxu0  ;;  %v676_v52 = vpop.f32.mrb[27].mxu1  ;;  %1351 = vmatmul.mubr.bf16.gmra.mrb[84].mxu0 %v971_v43  ;;  %1512 = vmatmul.mubr.bf16.gmra.mrb[84].mxu1 %v973_v44 }
 0x160   :  { %v794_v53 = vpack.c.bf16 %v483_v51, %v479_v39  ;;  %v796_v54 = vpack.c.bf16 %v676_v52, %v672_v40 }
 0x161   :  { %v911_v55 = vadd.bf16 %v2557_v41, %v793_v49  ;;  %v913_v56 = vadd.bf16 %v2559_v42, %v795_v50 }
 0x162   :  { %v912_v57 = vadd.bf16 %v2561_v45, %v794_v53  ;;  %v914_v58 = vadd.bf16 %v2563_v46, %v796_v54 }
 0x163   :  { %v975_v2 = vmax.bf16 %v2448_v0, %v911_v55  ;;  %v977_v3 = vmax.bf16 %v2448_v0, %v913_v56 }
 0x164   :  { %v487_v59 = vpop.f32.mrb[28].mxu0  ;;  %v680_v60 = vpop.f32.mrb[28].mxu1  ;;  %v976_v61 = vmax.bf16 %v2448_v0, %v912_v57  ;;  %v978_v62 = vmax.bf16 %v2448_v0, %v914_v58 }
 0x165   :  { %v489_v63 = vpop.f32.mrb[29].mxu0  ;;  %v682_v1 = vpop.f32.mrb[29].mxu1 }
 0x166   :  { %v491_v4 = vpop.f32.mrb[30].mxu0  ;;  %v684_v5 = vpop.f32.mrb[30].mxu1  ;;  %1358 = vmatprep.mubr.bf16.mxu0 %v976_v61  ;;  %1519 = vmatprep.mubr.bf16.mxu1 %v978_v62 }
 0x167   :  { %v797_v6 = vpack.c.bf16 %v491_v4, %v487_v59  ;;  %v799_v7 = vpack.c.bf16 %v684_v5, %v680_v60  ;;  %v493_v8 = vpop.f32.mrb[31].mxu0  ;;  %v686_v9 = vpop.f32.mrb[31].mxu1  ;;  %1359 = vmatmul.mubr.bf16.gmra.mrb[88].mxu0 %v975_v2  ;;  %1520 = vmatmul.mubr.bf16.gmra.mrb[88].mxu1 %v977_v3 }
 0x168   :  { %v798_v10 = vpack.c.bf16 %v493_v8, %v489_v63  ;;  %v800_v11 = vpack.c.bf16 %v686_v9, %v682_v1 }
 0x169   :  { %v915_v12 = vadd.bf16 %v2557_v41, %v797_v6  ;;  %v917_v13 = vadd.bf16 %v2559_v42, %v799_v7 }
 0x16a   :  { %v916_v14 = vadd.bf16 %v2561_v45, %v798_v10  ;;  %v918_v15 = vadd.bf16 %v2563_v46, %v800_v11 }
 0x16b   :  { %v979_v22 = vmax.bf16 %v2448_v0, %v915_v12  ;;  %v981_v23 = vmax.bf16 %v2448_v0, %v917_v13 }
 0x16c   :  { %v497_v16 = vpop.f32.mrb[32].mxu0  ;;  %v690_v17 = vpop.f32.mrb[32].mxu1  ;;  %v980_v18 = vmax.bf16 %v2448_v0, %v916_v14  ;;  %v982_v19 = vmax.bf16 %v2448_v0, %v918_v15 }
 0x16d   :  { %v499_v20 = vpop.f32.mrb[33].mxu0  ;;  %v692_v21 = vpop.f32.mrb[33].mxu1 }
 0x16e   :  { %v501_v24 = vpop.f32.mrb[34].mxu0  ;;  %v694_v25 = vpop.f32.mrb[34].mxu1  ;;  %1366 = vmatprep.mubr.bf16.mxu0 %v980_v18  ;;  %1527 = vmatprep.mubr.bf16.mxu1 %v982_v19 }
 0x16f   :  { %v801_v26 = vpack.c.bf16 %v501_v24, %v497_v16  ;;  %v803_v27 = vpack.c.bf16 %v694_v25, %v690_v17  ;;  %v503_v28 = vpop.f32.mrb[35].mxu0  ;;  %v696_v29 = vpop.f32.mrb[35].mxu1  ;;  %1367 = vmatmul.mubr.bf16.gmra.mrb[92].mxu0 %v979_v22  ;;  %1528 = vmatmul.mubr.bf16.gmra.mrb[92].mxu1 %v981_v23 }
 0x170   :  { %v802_v30 = vpack.c.bf16 %v503_v28, %v499_v20  ;;  %v804_v31 = vpack.c.bf16 %v696_v29, %v692_v21 }
 0x171   :  { %v919_v32 = vadd.bf16 %v2557_v41, %v801_v26  ;;  %v921_v33 = vadd.bf16 %v2559_v42, %v803_v27 }
 0x172   :  { %v920_v34 = vadd.bf16 %v2561_v45, %v802_v30  ;;  %v922_v35 = vadd.bf16 %v2563_v46, %v804_v31 }
 0x173   :  { %v983_v44 = vmax.bf16 %v2448_v0, %v919_v32  ;;  %v985_v47 = vmax.bf16 %v2448_v0, %v921_v33 }
 0x174   :  { %v507_v36 = vpop.f32.mrb[36].mxu0  ;;  %v700_v37 = vpop.f32.mrb[36].mxu1  ;;  %v984_v38 = vmax.bf16 %v2448_v0, %v920_v34  ;;  %v986_v39 = vmax.bf16 %v2448_v0, %v922_v35 }
 0x175   :  { %v509_v40 = vpop.f32.mrb[37].mxu0  ;;  %v702_v43 = vpop.f32.mrb[37].mxu1 }
 0x176   :  { %v511_v48 = vpop.f32.mrb[38].mxu0  ;;  %v704_v49 = vpop.f32.mrb[38].mxu1  ;;  %1374 = vmatprep.mubr.bf16.mxu0 %v984_v38  ;;  %1535 = vmatprep.mubr.bf16.mxu1 %v986_v39 }
 0x177   :  { %v805_v50 = vpack.c.bf16 %v511_v48, %v507_v36  ;;  %v807_v51 = vpack.c.bf16 %v704_v49, %v700_v37  ;;  %v513_v52 = vpop.f32.mrb[39].mxu0  ;;  %v706_v53 = vpop.f32.mrb[39].mxu1  ;;  %1375 = vmatmul.mubr.bf16.gmra.mrb[96].mxu0 %v983_v44  ;;  %1536 = vmatmul.mubr.bf16.gmra.mrb[96].mxu1 %v985_v47 }
 0x178   :  { %v806_v54 = vpack.c.bf16 %v513_v52, %v509_v40  ;;  %v808_v55 = vpack.c.bf16 %v706_v53, %v702_v43 }
 0x179   :  { %v923_v56 = vadd.bf16 %v2557_v41, %v805_v50  ;;  %v925_v57 = vadd.bf16 %v2559_v42, %v807_v51 }
 0x17a   :  { %v924_v58 = vadd.bf16 %v2561_v45, %v806_v54  ;;  %v926_v59 = vadd.bf16 %v2563_v46, %v808_v55 }
 0x17b   :  { %v987_v3 = vmax.bf16 %v2448_v0, %v923_v56  ;;  %v989_v4 = vmax.bf16 %v2448_v0, %v925_v57 }
 0x17c   :  { %v517_v60 = vpop.f32.mrb[40].mxu0  ;;  %v710_v61 = vpop.f32.mrb[40].mxu1  ;;  %v988_v62 = vmax.bf16 %v2448_v0, %v924_v58  ;;  %v990_v63 = vmax.bf16 %v2448_v0, %v926_v59 }
 0x17d   :  { %v519_v1 = vpop.f32.mrb[41].mxu0  ;;  %v712_v2 = vpop.f32.mrb[41].mxu1 }
 0x17e   :  { %v521_v5 = vpop.f32.mrb[42].mxu0  ;;  %v714_v6 = vpop.f32.mrb[42].mxu1  ;;  %1382 = vmatprep.mubr.bf16.mxu0 %v988_v62  ;;  %1543 = vmatprep.mubr.bf16.mxu1 %v990_v63 }
 0x17f   :  { %v809_v7 = vpack.c.bf16 %v521_v5, %v517_v60  ;;  %v811_v8 = vpack.c.bf16 %v714_v6, %v710_v61  ;;  %v523_v9 = vpop.f32.mrb[43].mxu0  ;;  %v716_v10 = vpop.f32.mrb[43].mxu1  ;;  %1383 = vmatmul.mubr.bf16.gmra.mrb[100].mxu0 %v987_v3  ;;  %1544 = vmatmul.mubr.bf16.gmra.mrb[100].mxu1 %v989_v4 }
 0x180   :  { %v810_v11 = vpack.c.bf16 %v523_v9, %v519_v1  ;;  %v812_v12 = vpack.c.bf16 %v716_v10, %v712_v2 }
 0x181   :  { %v927_v13 = vadd.bf16 %v2557_v41, %v809_v7  ;;  %v929_v14 = vadd.bf16 %v2559_v42, %v811_v8 }
 0x182   :  { %v928_v15 = vadd.bf16 %v2561_v45, %v810_v11  ;;  %v930_v16 = vadd.bf16 %v2563_v46, %v812_v12 }
 0x183   :  { %v991_v23 = vmax.bf16 %v2448_v0, %v927_v13  ;;  %v993_v24 = vmax.bf16 %v2448_v0, %v929_v14 }
 0x184   :  { %v527_v17 = vpop.f32.mrb[44].mxu0  ;;  %v720_v18 = vpop.f32.mrb[44].mxu1  ;;  %v992_v19 = vmax.bf16 %v2448_v0, %v928_v15  ;;  %v994_v20 = vmax.bf16 %v2448_v0, %v930_v16 }
 0x185   :  { %v529_v21 = vpop.f32.mrb[45].mxu0  ;;  %v722_v22 = vpop.f32.mrb[45].mxu1 }
 0x186   :  { %v531_v25 = vpop.f32.mrb[46].mxu0  ;;  %v724_v26 = vpop.f32.mrb[46].mxu1  ;;  %1390 = vmatprep.mubr.bf16.mxu0 %v992_v19  ;;  %1551 = vmatprep.mubr.bf16.mxu1 %v994_v20 }
 0x187   :  { %v813_v27 = vpack.c.bf16 %v531_v25, %v527_v17  ;;  %v815_v28 = vpack.c.bf16 %v724_v26, %v720_v18  ;;  %v533_v29 = vpop.f32.mrb[47].mxu0  ;;  %v726_v30 = vpop.f32.mrb[47].mxu1  ;;  %1391 = vmatmul.mubr.bf16.gmra.mrb[104].mxu0 %v991_v23  ;;  %1552 = vmatmul.mubr.bf16.gmra.mrb[104].mxu1 %v993_v24 }
 0x188   :  { %v814_v31 = vpack.c.bf16 %v533_v29, %v529_v21  ;;  %v816_v32 = vpack.c.bf16 %v726_v30, %v722_v22 }
 0x189   :  { %v931_v33 = vadd.bf16 %v2557_v41, %v813_v27  ;;  %v933_v34 = vadd.bf16 %v2559_v42, %v815_v28 }
 0x18a   :  { %v932_v35 = vadd.bf16 %v2561_v45, %v814_v31  ;;  %v934_v36 = vadd.bf16 %v2563_v46, %v816_v32 }
 0x18b   :  { %v995_v47 = vmax.bf16 %v2448_v0, %v931_v33  ;;  %v997_v48 = vmax.bf16 %v2448_v0, %v933_v34 }
 0x18c   :  { %v537_v37 = vpop.f32.mrb[48].mxu0  ;;  %v730_v38 = vpop.f32.mrb[48].mxu1  ;;  %v996_v39 = vmax.bf16 %v2448_v0, %v932_v35  ;;  %v998_v40 = vmax.bf16 %v2448_v0, %v934_v36 }
 0x18d   :  { %v539_v43 = vpop.f32.mrb[49].mxu0  ;;  %v732_v44 = vpop.f32.mrb[49].mxu1 }
 0x18e   :  { %v541_v49 = vpop.f32.mrb[50].mxu0  ;;  %v734_v50 = vpop.f32.mrb[50].mxu1  ;;  %1398 = vmatprep.mubr.bf16.mxu0 %v996_v39  ;;  %1559 = vmatprep.mubr.bf16.mxu1 %v998_v40 }
 0x18f   :  { %v817_v51 = vpack.c.bf16 %v541_v49, %v537_v37  ;;  %v819_v52 = vpack.c.bf16 %v734_v50, %v730_v38  ;;  %v543_v53 = vpop.f32.mrb[51].mxu0  ;;  %v736_v54 = vpop.f32.mrb[51].mxu1  ;;  %1399 = vmatmul.mubr.bf16.gmra.mrb[108].mxu0 %v995_v47  ;;  %1560 = vmatmul.mubr.bf16.gmra.mrb[108].mxu1 %v997_v48 }
 0x190   :  { %v818_v55 = vpack.c.bf16 %v543_v53, %v539_v43  ;;  %v820_v56 = vpack.c.bf16 %v736_v54, %v732_v44 }
 0x191   :  { %v935_v57 = vadd.bf16 %v2557_v41, %v817_v51  ;;  %v937_v58 = vadd.bf16 %v2559_v42, %v819_v52 }
 0x192   :  { %v936_v59 = vadd.bf16 %v2561_v45, %v818_v55  ;;  %v938_v60 = vadd.bf16 %v2563_v46, %v820_v56 }
 0x193   :  { %v999_v4 = vmax.bf16 %v2448_v0, %v935_v57  ;;  %v1001_v5 = vmax.bf16 %v2448_v0, %v937_v58 }
 0x194   :  { %v547_v61 = vpop.f32.mrb[52].mxu0  ;;  %v740_v62 = vpop.f32.mrb[52].mxu1  ;;  %v1000_v63 = vmax.bf16 %v2448_v0, %v936_v59  ;;  %v1002_v1 = vmax.bf16 %v2448_v0, %v938_v60 }
 0x195   :  { %v549_v2 = vpop.f32.mrb[53].mxu0  ;;  %v742_v3 = vpop.f32.mrb[53].mxu1 }
 0x196   :  { %v551_v6 = vpop.f32.mrb[54].mxu0  ;;  %v744_v7 = vpop.f32.mrb[54].mxu1  ;;  %1406 = vmatprep.mubr.bf16.mxu0 %v1000_v63  ;;  %1567 = vmatprep.mubr.bf16.mxu1 %v1002_v1 }
 0x197   :  { %v821_v8 = vpack.c.bf16 %v551_v6, %v547_v61  ;;  %v823_v9 = vpack.c.bf16 %v744_v7, %v740_v62  ;;  %v553_v10 = vpop.f32.mrb[55].mxu0  ;;  %v746_v11 = vpop.f32.mrb[55].mxu1  ;;  %1407 = vmatmul.mubr.bf16.gmra.mrb[112].mxu0 %v999_v4  ;;  %1568 = vmatmul.mubr.bf16.gmra.mrb[112].mxu1 %v1001_v5 }
 0x198   :  { %v822_v12 = vpack.c.bf16 %v553_v10, %v549_v2  ;;  %v824_v13 = vpack.c.bf16 %v746_v11, %v742_v3 }
 0x199   :  { %v939_v14 = vadd.bf16 %v2557_v41, %v821_v8  ;;  %v941_v15 = vadd.bf16 %v2559_v42, %v823_v9 }
 0x19a   :  { %v940_v16 = vadd.bf16 %v2561_v45, %v822_v12  ;;  %v942_v17 = vadd.bf16 %v2563_v46, %v824_v13 }
 0x19b   :  { %v1003_v24 = vmax.bf16 %v2448_v0, %v939_v14  ;;  %v1005_v25 = vmax.bf16 %v2448_v0, %v941_v15 }
 0x19c   :  { %v557_v18 = vpop.f32.mrb[56].mxu0  ;;  %v750_v19 = vpop.f32.mrb[56].mxu1  ;;  %v1004_v20 = vmax.bf16 %v2448_v0, %v940_v16  ;;  %v1006_v21 = vmax.bf16 %v2448_v0, %v942_v17 }
 0x19d   :  { %v559_v22 = vpop.f32.mrb[57].mxu0  ;;  %v752_v23 = vpop.f32.mrb[57].mxu1 }
 0x19e   :  { %v561_v26 = vpop.f32.mrb[58].mxu0  ;;  %v754_v27 = vpop.f32.mrb[58].mxu1  ;;  %1414 = vmatprep.mubr.bf16.mxu0 %v1004_v20  ;;  %1575 = vmatprep.mubr.bf16.mxu1 %v1006_v21 }
 0x19f   :  { %v825_v28 = vpack.c.bf16 %v561_v26, %v557_v18  ;;  %v827_v29 = vpack.c.bf16 %v754_v27, %v750_v19  ;;  %v563_v30 = vpop.f32.mrb[59].mxu0  ;;  %v756_v31 = vpop.f32.mrb[59].mxu1  ;;  %1415 = vmatmul.mubr.bf16.gmra.mrb[116].mxu0 %v1003_v24  ;;  %1576 = vmatmul.mubr.bf16.gmra.mrb[116].mxu1 %v1005_v25 }
 0x1a0   :  { %v826_v32 = vpack.c.bf16 %v563_v30, %v559_v22  ;;  %v828_v33 = vpack.c.bf16 %v756_v31, %v752_v23 }
 0x1a1   :  { %v943_v34 = vadd.bf16 %v2557_v41, %v825_v28  ;;  %v945_v35 = vadd.bf16 %v2559_v42, %v827_v29 }
 0x1a2   :  { %v944_v36 = vadd.bf16 %v2561_v45, %v826_v32  ;;  %v946_v37 = vadd.bf16 %v2563_v46, %v828_v33 }
 0x1a3   :  { %v1007_v48 = vmax.bf16 %v2448_v0, %v943_v34  ;;  %v1009_v49 = vmax.bf16 %v2448_v0, %v945_v35 }
 0x1a4   :  { %v567_v38 = vpop.f32.mrb[60].mxu0  ;;  %v760_v39 = vpop.f32.mrb[60].mxu1  ;;  %v1008_v40 = vmax.bf16 %v2448_v0, %v944_v36  ;;  %v1010_v43 = vmax.bf16 %v2448_v0, %v946_v37 }
 0x1a5   :  { %v569_v44 = vpop.f32.mrb[61].mxu0  ;;  %v762_v47 = vpop.f32.mrb[61].mxu1 }
 0x1a6   :  { %v571_v50 = vpop.f32.mrb[62].mxu0  ;;  %v764_v51 = vpop.f32.mrb[62].mxu1  ;;  %1422 = vmatprep.mubr.bf16.mxu0 %v1008_v40  ;;  %1583 = vmatprep.mubr.bf16.mxu1 %v1010_v43 }
 0x1a7   :  { %v829_v52 = vpack.c.bf16 %v571_v50, %v567_v38  ;;  %v831_v53 = vpack.c.bf16 %v764_v51, %v760_v39  ;;  %v573_v54 = vpop.f32.mrb[63].mxu0  ;;  %v766_v55 = vpop.f32.mrb[63].mxu1  ;;  %1423 = vmatmul.mubr.bf16.gmra.mrb[120].mxu0 %v1007_v48  ;;  %1584 = vmatmul.mubr.bf16.gmra.mrb[120].mxu1 %v1009_v49 }
 0x1a8   :  { %v830_v56 = vpack.c.bf16 %v573_v54, %v569_v44  ;;  %v832_v57 = vpack.c.bf16 %v766_v55, %v762_v47 }
 0x1a9   :  { %v947_v58 = vadd.bf16 %v2557_v41, %v829_v52  ;;  %v949_v59 = vadd.bf16 %v2559_v42, %v831_v53  ;;  %v2696_v42 = vld [vmem:[%s2749_s4] ss:$0 sm:$0xff]  ;;  %s2449_s4 = smov [#allocation8]  }
 0x1aa   :  { %v948_v60 = vadd.bf16 %v2561_v45, %v830_v56  ;;  %v950_v61 = vadd.bf16 %v2563_v46, %v832_v57  ;;  %s1765_s8 = sshll.u32 %s2449_s4, 4  ;;  %s1766_s8 = int_to_ptr.vmem [resolvable:$true] %s1765_s8 }
 0x1ab   :  { %v1011_v1 = vmax.bf16 %v2448_v0, %v947_v58  ;;  %v1013_v2 = vmax.bf16 %v2448_v0, %v949_v59  ;;  %s2413_s9 = scalar_lea.vmem %s1766_s8, 2048  ;;  %p2418_p11 = scmp.lt.s32.totalorder %s1766_s8, %s1766_s8 }
 0x1ac   :  { %v1012_v62 = vmax.bf16 %v2448_v0, %v948_v60  ;;  %v1014_v63 = vmax.bf16 %v2448_v0, %v950_v61  ;;  %p2414_p10 = scmp.ne.s32.totalorder %s1766_s8, %s2413_s9  ;;  %p2419_p12 = scmp.lt.s32.totalorder %s2413_s9, %s2413_s9 }
 0x1ae   :  { %1430 = vmatprep.mubr.bf16.mxu0 %v1012_v62  ;;  %1591 = vmatprep.mubr.bf16.mxu1 %v1014_v63  ;;  %p2420_p13 = por %p2419_p12, %p2418_p11 }
 0x1af   :  { %1431 = vmatmul.mubr.bf16.gmra.mrb[124].mxu0 %v1011_v1  ;;  %1592 = vmatmul.mubr.bf16.gmra.mrb[124].mxu1 %v1013_v2 }
 0x1b0   :  { %p2421_p0 = pnand %p2420_p13, %p2414_p10 }
 0x20a   :  { %v2034_v3 = vpop.f32.mrb[64].mxu0  ;;  %v2146_v41 = vpop.f32.mrb[64].mxu1 }
 0x20b   :  { %v2035_v45 = vpop.f32.mrb[65].mxu0  ;;  %v2147_v46 = vpop.f32.mrb[65].mxu1 }
 0x20c   :  { %v2036_v4 = vadd.f32 %v2035_v45, %v2034_v3  ;;  %v2148_v5 = vadd.f32 %v2147_v46, %v2146_v41  ;;  %v2037_v6 = vpop.f32.mrb[66].mxu0  ;;  %v2149_v7 = vpop.f32.mrb[66].mxu1 }
 0x20d   :  { %v2038_v8 = vpop.f32.mrb[67].mxu0  ;;  %v2150_v9 = vpop.f32.mrb[67].mxu1 }
 0x20e   :  { %v1313_v0 = vadd.f32 %v2036_v4, %v2696_v42  ;;  %v2039_v10 = vadd.f32 %v2038_v8, %v2037_v6  ;;  %v2151_v11 = vadd.f32 %v2150_v9, %v2149_v7 }
 0x210   :  { %v1474_v12 = vadd.f32 %v2148_v5, %v1313_v0  ;;  %v1316_v13 = vadd.f32 %v2039_v10, %v2696_v42 }
 0x212   :  { %v1477_v14 = vadd.f32 %v2151_v11, %v1316_v13  ;;  %v2040_v15 = vpop.f32.mrb[68].mxu0  ;;  %v2152_v16 = vpop.f32.mrb[68].mxu1 }
 0x213   :  { %v2041_v17 = vpop.f32.mrb[69].mxu0  ;;  %v2153_v18 = vpop.f32.mrb[69].mxu1 }
 0x214   :  { %v1926_v19 = vpack.c.bf16 %v1477_v14, %v1474_v12  ;;  %v2042_v20 = vadd.f32 %v2041_v17, %v2040_v15  ;;  %v2154_v21 = vadd.f32 %v2153_v18, %v2152_v16  ;;  %v2043_v22 = vpop.f32.mrb[70].mxu0  ;;  %v2155_v23 = vpop.f32.mrb[70].mxu1 }
 0x215   :  { %v2044_v24 = vpop.f32.mrb[71].mxu0  ;;  %v2156_v25 = vpop.f32.mrb[71].mxu1 }
 0x216   :  { %1927 = vst [vmem:[#allocation8] sm:$0xff] %v1926_v19   ;;  %v1321_v26 = vadd.f32 %v2042_v20, %v2696_v42  ;;  %v2045_v27 = vadd.f32 %v2044_v24, %v2043_v22  ;;  %v2157_v28 = vadd.f32 %v2156_v25, %v2155_v23 }
 0x218   :  { %v1482_v29 = vadd.f32 %v2154_v21, %v1321_v26  ;;  %v1324_v30 = vadd.f32 %v2045_v27, %v2696_v42 }
 0x21a   :  { %v1485_v31 = vadd.f32 %v2157_v28, %v1324_v30  ;;  %v2046_v32 = vpop.f32.mrb[72].mxu0  ;;  %v2158_v33 = vpop.f32.mrb[72].mxu1 }
 0x21b   :  { %v2047_v34 = vpop.f32.mrb[73].mxu0  ;;  %v2159_v35 = vpop.f32.mrb[73].mxu1 }
 0x21c   :  { %v1931_v36 = vpack.c.bf16 %v1485_v31, %v1482_v29  ;;  %v2048_v37 = vadd.f32 %v2047_v34, %v2046_v32  ;;  %v2160_v38 = vadd.f32 %v2159_v35, %v2158_v33  ;;  %v2049_v39 = vpop.f32.mrb[74].mxu0  ;;  %v2161_v40 = vpop.f32.mrb[74].mxu1 }
 0x21d   :  { %v2050_v43 = vpop.f32.mrb[75].mxu0  ;;  %v2162_v44 = vpop.f32.mrb[75].mxu1 }
 0x21e   :  { %2003 = vst [vmem:[#allocation8 + $0x8] sm:$0xff] %v1931_v36   ;;  %v1329_v47 = vadd.f32 %v2048_v37, %v2696_v42  ;;  %v2051_v48 = vadd.f32 %v2050_v43, %v2049_v39  ;;  %v2163_v49 = vadd.f32 %v2162_v44, %v2161_v40 }
 0x220   :  { %v1490_v50 = vadd.f32 %v2160_v38, %v1329_v47  ;;  %v1332_v51 = vadd.f32 %v2051_v48, %v2696_v42 }
 0x222   :  { %v1493_v52 = vadd.f32 %v2163_v49, %v1332_v51  ;;  %v2052_v53 = vpop.f32.mrb[76].mxu0  ;;  %v2164_v54 = vpop.f32.mrb[76].mxu1 }
 0x223   :  { %v2053_v55 = vpop.f32.mrb[77].mxu0  ;;  %v2165_v56 = vpop.f32.mrb[77].mxu1 }
 0x224   :  { %v1936_v57 = vpack.c.bf16 %v1493_v52, %v1490_v50  ;;  %v2054_v58 = vadd.f32 %v2053_v55, %v2052_v53  ;;  %v2166_v59 = vadd.f32 %v2165_v56, %v2164_v54  ;;  %v2055_v60 = vpop.f32.mrb[78].mxu0  ;;  %v2167_v61 = vpop.f32.mrb[78].mxu1 }
 0x225   :  { %v2056_v62 = vpop.f32.mrb[79].mxu0  ;;  %v2168_v63 = vpop.f32.mrb[79].mxu1 }
 0x226   :  { %2004 = vst [vmem:[#allocation8 + $0x10] sm:$0xff] %v1936_v57   ;;  %v1337_v1 = vadd.f32 %v2054_v58, %v2696_v42  ;;  %v2057_v2 = vadd.f32 %v2056_v62, %v2055_v60  ;;  %v2169_v3 = vadd.f32 %v2168_v63, %v2167_v61 }
 0x228   :  { %v1498_v41 = vadd.f32 %v2166_v59, %v1337_v1  ;;  %v1340_v45 = vadd.f32 %v2057_v2, %v2696_v42 }
 0x22a   :  { %v1501_v46 = vadd.f32 %v2169_v3, %v1340_v45  ;;  %v2058_v4 = vpop.f32.mrb[80].mxu0  ;;  %v2170_v5 = vpop.f32.mrb[80].mxu1 }
 0x22b   :  { %v2059_v6 = vpop.f32.mrb[81].mxu0  ;;  %v2171_v7 = vpop.f32.mrb[81].mxu1 }
 0x22c   :  { %v1941_v8 = vpack.c.bf16 %v1501_v46, %v1498_v41  ;;  %v2060_v9 = vadd.f32 %v2059_v6, %v2058_v4  ;;  %v2172_v0 = vadd.f32 %v2171_v7, %v2170_v5  ;;  %v2061_v10 = vpop.f32.mrb[82].mxu0  ;;  %v2173_v11 = vpop.f32.mrb[82].mxu1 }
 0x22d   :  { %v2062_v12 = vpop.f32.mrb[83].mxu0  ;;  %v2174_v13 = vpop.f32.mrb[83].mxu1 }
 0x22e   :  { %2005 = vst [vmem:[#allocation8 + $0x18] sm:$0xff] %v1941_v8   ;;  %v1345_v14 = vadd.f32 %v2060_v9, %v2696_v42  ;;  %v2063_v15 = vadd.f32 %v2062_v12, %v2061_v10  ;;  %v2175_v16 = vadd.f32 %v2174_v13, %v2173_v11 }
 0x230   :  { %v1506_v17 = vadd.f32 %v2172_v0, %v1345_v14  ;;  %v1348_v18 = vadd.f32 %v2063_v15, %v2696_v42 }
 0x232   :  { %v1509_v19 = vadd.f32 %v2175_v16, %v1348_v18  ;;  %v2064_v20 = vpop.f32.mrb[84].mxu0  ;;  %v2176_v21 = vpop.f32.mrb[84].mxu1 }
 0x233   :  { %v2065_v22 = vpop.f32.mrb[85].mxu0  ;;  %v2177_v23 = vpop.f32.mrb[85].mxu1 }
 0x234   :  { %v1946_v24 = vpack.c.bf16 %v1509_v19, %v1506_v17  ;;  %v2066_v25 = vadd.f32 %v2065_v22, %v2064_v20  ;;  %v2178_v26 = vadd.f32 %v2177_v23, %v2176_v21  ;;  %v2067_v27 = vpop.f32.mrb[86].mxu0  ;;  %v2179_v28 = vpop.f32.mrb[86].mxu1 }
 0x235   :  { %v2068_v29 = vpop.f32.mrb[87].mxu0  ;;  %v2180_v30 = vpop.f32.mrb[87].mxu1 }
 0x236   :  { %2006 = vst [vmem:[#allocation8 + $0x20] sm:$0xff] %v1946_v24   ;;  %v1353_v31 = vadd.f32 %v2066_v25, %v2696_v42  ;;  %v2069_v32 = vadd.f32 %v2068_v29, %v2067_v27  ;;  %v2181_v33 = vadd.f32 %v2180_v30, %v2179_v28 }
 0x238   :  { %v1514_v34 = vadd.f32 %v2178_v26, %v1353_v31  ;;  %v1356_v35 = vadd.f32 %v2069_v32, %v2696_v42 }
 0x23a   :  { %v1517_v36 = vadd.f32 %v2181_v33, %v1356_v35  ;;  %v2070_v37 = vpop.f32.mrb[88].mxu0  ;;  %v2182_v38 = vpop.f32.mrb[88].mxu1 }
 0x23b   :  { %v2071_v39 = vpop.f32.mrb[89].mxu0  ;;  %v2183_v40 = vpop.f32.mrb[89].mxu1 }
 0x23c   :  { %v1951_v43 = vpack.c.bf16 %v1517_v36, %v1514_v34  ;;  %v2072_v44 = vadd.f32 %v2071_v39, %v2070_v37  ;;  %v2184_v47 = vadd.f32 %v2183_v40, %v2182_v38  ;;  %v2073_v48 = vpop.f32.mrb[90].mxu0  ;;  %v2185_v49 = vpop.f32.mrb[90].mxu1 }
 0x23d   :  { %v2074_v50 = vpop.f32.mrb[91].mxu0  ;;  %v2186_v51 = vpop.f32.mrb[91].mxu1 }
 0x23e   :  { %2007 = vst [vmem:[#allocation8 + $0x28] sm:$0xff] %v1951_v43   ;;  %v1361_v52 = vadd.f32 %v2072_v44, %v2696_v42  ;;  %v2075_v53 = vadd.f32 %v2074_v50, %v2073_v48  ;;  %v2187_v54 = vadd.f32 %v2186_v51, %v2185_v49 }
 0x240   :  { %v1522_v55 = vadd.f32 %v2184_v47, %v1361_v52  ;;  %v1364_v56 = vadd.f32 %v2075_v53, %v2696_v42 }
 0x242   :  { %v1525_v57 = vadd.f32 %v2187_v54, %v1364_v56  ;;  %v2076_v58 = vpop.f32.mrb[92].mxu0  ;;  %v2188_v59 = vpop.f32.mrb[92].mxu1 }
 0x243   :  { %v2077_v60 = vpop.f32.mrb[93].mxu0  ;;  %v2189_v61 = vpop.f32.mrb[93].mxu1 }
 0x244   :  { %v1956_v62 = vpack.c.bf16 %v1525_v57, %v1522_v55  ;;  %v2078_v63 = vadd.f32 %v2077_v60, %v2076_v58  ;;  %v2190_v1 = vadd.f32 %v2189_v61, %v2188_v59  ;;  %v2079_v2 = vpop.f32.mrb[94].mxu0  ;;  %v2191_v3 = vpop.f32.mrb[94].mxu1 }
 0x245   :  { %v2080_v41 = vpop.f32.mrb[95].mxu0  ;;  %v2192_v45 = vpop.f32.mrb[95].mxu1 }
 0x246   :  { %2008 = vst [vmem:[#allocation8 + $0x30] sm:$0xff] %v1956_v62   ;;  %v1369_v46 = vadd.f32 %v2078_v63, %v2696_v42  ;;  %v2081_v4 = vadd.f32 %v2080_v41, %v2079_v2  ;;  %v2193_v5 = vadd.f32 %v2192_v45, %v2191_v3 }
 0x248   :  { %v1530_v6 = vadd.f32 %v2190_v1, %v1369_v46  ;;  %v1372_v7 = vadd.f32 %v2081_v4, %v2696_v42 }
 0x24a   :  { %v1533_v8 = vadd.f32 %v2193_v5, %v1372_v7  ;;  %v2082_v9 = vpop.f32.mrb[96].mxu0  ;;  %v2194_v0 = vpop.f32.mrb[96].mxu1 }
 0x24b   :  { %v2083_v10 = vpop.f32.mrb[97].mxu0  ;;  %v2195_v11 = vpop.f32.mrb[97].mxu1 }
 0x24c   :  { %v1961_v12 = vpack.c.bf16 %v1533_v8, %v1530_v6  ;;  %v2084_v13 = vadd.f32 %v2083_v10, %v2082_v9  ;;  %v2196_v14 = vadd.f32 %v2195_v11, %v2194_v0  ;;  %v2085_v15 = vpop.f32.mrb[98].mxu0  ;;  %v2197_v16 = vpop.f32.mrb[98].mxu1 }
 0x24d   :  { %v2086_v17 = vpop.f32.mrb[99].mxu0  ;;  %v2198_v18 = vpop.f32.mrb[99].mxu1 }
 0x24e   :  { %2009 = vst [vmem:[#allocation8 + $0x38] sm:$0xff] %v1961_v12   ;;  %v1377_v19 = vadd.f32 %v2084_v13, %v2696_v42  ;;  %v2087_v20 = vadd.f32 %v2086_v17, %v2085_v15  ;;  %v2199_v21 = vadd.f32 %v2198_v18, %v2197_v16 }
 0x250   :  { %v1538_v22 = vadd.f32 %v2196_v14, %v1377_v19  ;;  %v1380_v23 = vadd.f32 %v2087_v20, %v2696_v42 }
 0x252   :  { %v1541_v24 = vadd.f32 %v2199_v21, %v1380_v23  ;;  %v2088_v25 = vpop.f32.mrb[100].mxu0  ;;  %v2200_v26 = vpop.f32.mrb[100].mxu1 }
 0x253   :  { %v2089_v27 = vpop.f32.mrb[101].mxu0  ;;  %v2201_v28 = vpop.f32.mrb[101].mxu1 }
 0x254   :  { %v1966_v29 = vpack.c.bf16 %v1541_v24, %v1538_v22  ;;  %v2090_v30 = vadd.f32 %v2089_v27, %v2088_v25  ;;  %v2202_v31 = vadd.f32 %v2201_v28, %v2200_v26  ;;  %v2091_v32 = vpop.f32.mrb[102].mxu0  ;;  %v2203_v33 = vpop.f32.mrb[102].mxu1 }
 0x255   :  { %v2092_v34 = vpop.f32.mrb[103].mxu0  ;;  %v2204_v35 = vpop.f32.mrb[103].mxu1 }
 0x256   :  { %2010 = vst [vmem:[#allocation8 + $0x40] sm:$0xff] %v1966_v29   ;;  %v1385_v36 = vadd.f32 %v2090_v30, %v2696_v42  ;;  %v2093_v37 = vadd.f32 %v2092_v34, %v2091_v32  ;;  %v2205_v38 = vadd.f32 %v2204_v35, %v2203_v33 }
 0x258   :  { %v1546_v39 = vadd.f32 %v2202_v31, %v1385_v36  ;;  %v1388_v40 = vadd.f32 %v2093_v37, %v2696_v42 }
 0x25a   :  { %v1549_v43 = vadd.f32 %v2205_v38, %v1388_v40  ;;  %v2094_v44 = vpop.f32.mrb[104].mxu0  ;;  %v2206_v47 = vpop.f32.mrb[104].mxu1 }
 0x25b   :  { %v2095_v48 = vpop.f32.mrb[105].mxu0  ;;  %v2207_v49 = vpop.f32.mrb[105].mxu1 }
 0x25c   :  { %v1971_v50 = vpack.c.bf16 %v1549_v43, %v1546_v39  ;;  %v2096_v51 = vadd.f32 %v2095_v48, %v2094_v44  ;;  %v2208_v52 = vadd.f32 %v2207_v49, %v2206_v47  ;;  %v2097_v53 = vpop.f32.mrb[106].mxu0  ;;  %v2209_v54 = vpop.f32.mrb[106].mxu1 }
 0x25d   :  { %v2098_v55 = vpop.f32.mrb[107].mxu0  ;;  %v2210_v56 = vpop.f32.mrb[107].mxu1 }
 0x25e   :  { %2011 = vst [vmem:[#allocation8 + $0x48] sm:$0xff] %v1971_v50   ;;  %v1393_v57 = vadd.f32 %v2096_v51, %v2696_v42  ;;  %v2099_v58 = vadd.f32 %v2098_v55, %v2097_v53  ;;  %v2211_v59 = vadd.f32 %v2210_v56, %v2209_v54 }
 0x260   :  { %v1554_v60 = vadd.f32 %v2208_v52, %v1393_v57  ;;  %v1396_v61 = vadd.f32 %v2099_v58, %v2696_v42 }
 0x262   :  { %v1557_v62 = vadd.f32 %v2211_v59, %v1396_v61  ;;  %v2100_v63 = vpop.f32.mrb[108].mxu0  ;;  %v2212_v1 = vpop.f32.mrb[108].mxu1 }
 0x263   :  { %v2101_v2 = vpop.f32.mrb[109].mxu0  ;;  %v2213_v3 = vpop.f32.mrb[109].mxu1 }
 0x264   :  { %v1976_v41 = vpack.c.bf16 %v1557_v62, %v1554_v60  ;;  %v2102_v45 = vadd.f32 %v2101_v2, %v2100_v63  ;;  %v2214_v46 = vadd.f32 %v2213_v3, %v2212_v1  ;;  %v2103_v4 = vpop.f32.mrb[110].mxu0  ;;  %v2215_v5 = vpop.f32.mrb[110].mxu1 }
 0x265   :  { %v2104_v6 = vpop.f32.mrb[111].mxu0  ;;  %v2216_v7 = vpop.f32.mrb[111].mxu1 }
 0x266   :  { %2012 = vst [vmem:[#allocation8 + $0x50] sm:$0xff] %v1976_v41   ;;  %v1401_v8 = vadd.f32 %v2102_v45, %v2696_v42  ;;  %v2105_v9 = vadd.f32 %v2104_v6, %v2103_v4  ;;  %v2217_v0 = vadd.f32 %v2216_v7, %v2215_v5 }
 0x268   :  { %v1562_v10 = vadd.f32 %v2214_v46, %v1401_v8  ;;  %v1404_v11 = vadd.f32 %v2105_v9, %v2696_v42 }
 0x26a   :  { %v1565_v12 = vadd.f32 %v2217_v0, %v1404_v11  ;;  %v2106_v13 = vpop.f32.mrb[112].mxu0  ;;  %v2218_v14 = vpop.f32.mrb[112].mxu1 }
 0x26b   :  { %v2107_v15 = vpop.f32.mrb[113].mxu0  ;;  %v2219_v16 = vpop.f32.mrb[113].mxu1 }
 0x26c   :  { %v1981_v17 = vpack.c.bf16 %v1565_v12, %v1562_v10  ;;  %v2108_v18 = vadd.f32 %v2107_v15, %v2106_v13  ;;  %v2220_v19 = vadd.f32 %v2219_v16, %v2218_v14  ;;  %v2109_v20 = vpop.f32.mrb[114].mxu0  ;;  %v2221_v21 = vpop.f32.mrb[114].mxu1 }
 0x26d   :  { %v2110_v22 = vpop.f32.mrb[115].mxu0  ;;  %v2222_v23 = vpop.f32.mrb[115].mxu1 }
 0x26e   :  { %2013 = vst [vmem:[#allocation8 + $0x58] sm:$0xff] %v1981_v17   ;;  %v1409_v24 = vadd.f32 %v2108_v18, %v2696_v42  ;;  %v2111_v25 = vadd.f32 %v2110_v22, %v2109_v20  ;;  %v2223_v26 = vadd.f32 %v2222_v23, %v2221_v21 }
 0x270   :  { %v1570_v27 = vadd.f32 %v2220_v19, %v1409_v24  ;;  %v1412_v28 = vadd.f32 %v2111_v25, %v2696_v42 }
 0x272   :  { %v1573_v29 = vadd.f32 %v2223_v26, %v1412_v28  ;;  %v2112_v30 = vpop.f32.mrb[116].mxu0  ;;  %v2224_v31 = vpop.f32.mrb[116].mxu1 }
 0x273   :  { %v2113_v32 = vpop.f32.mrb[117].mxu0  ;;  %v2225_v33 = vpop.f32.mrb[117].mxu1 }
 0x274   :  { %v1986_v34 = vpack.c.bf16 %v1573_v29, %v1570_v27  ;;  %v2114_v35 = vadd.f32 %v2113_v32, %v2112_v30  ;;  %v2226_v36 = vadd.f32 %v2225_v33, %v2224_v31  ;;  %v2115_v37 = vpop.f32.mrb[118].mxu0  ;;  %v2227_v38 = vpop.f32.mrb[118].mxu1 }
 0x275   :  { %v2116_v39 = vpop.f32.mrb[119].mxu0  ;;  %v2228_v40 = vpop.f32.mrb[119].mxu1 }
 0x276   :  { %2014 = vst [vmem:[#allocation8 + $0x60] sm:$0xff] %v1986_v34   ;;  %v1417_v43 = vadd.f32 %v2114_v35, %v2696_v42  ;;  %v2117_v44 = vadd.f32 %v2116_v39, %v2115_v37  ;;  %v2229_v47 = vadd.f32 %v2228_v40, %v2227_v38 }
 0x278   :  { %v1578_v48 = vadd.f32 %v2226_v36, %v1417_v43  ;;  %v1420_v49 = vadd.f32 %v2117_v44, %v2696_v42 }
 0x27a   :  { %v1581_v50 = vadd.f32 %v2229_v47, %v1420_v49  ;;  %v2118_v51 = vpop.f32.mrb[120].mxu0  ;;  %v2230_v52 = vpop.f32.mrb[120].mxu1 }
 0x27b   :  { %v2119_v53 = vpop.f32.mrb[121].mxu0  ;;  %v2231_v54 = vpop.f32.mrb[121].mxu1 }
 0x27c   :  { %v1991_v55 = vpack.c.bf16 %v1581_v50, %v1578_v48  ;;  %v2120_v56 = vadd.f32 %v2119_v53, %v2118_v51  ;;  %v2232_v57 = vadd.f32 %v2231_v54, %v2230_v52  ;;  %v2121_v58 = vpop.f32.mrb[122].mxu0  ;;  %v2233_v59 = vpop.f32.mrb[122].mxu1 }
 0x27d   :  { %v2122_v60 = vpop.f32.mrb[123].mxu0  ;;  %v2234_v61 = vpop.f32.mrb[123].mxu1 }
 0x27e   :  { %2015 = vst [vmem:[#allocation8 + $0x68] sm:$0xff] %v1991_v55   ;;  %v1425_v62 = vadd.f32 %v2120_v56, %v2696_v42  ;;  %v2123_v63 = vadd.f32 %v2122_v60, %v2121_v58  ;;  %v2235_v1 = vadd.f32 %v2234_v61, %v2233_v59 }
 0x280   :  { %v1586_v2 = vadd.f32 %v2232_v57, %v1425_v62  ;;  %v1428_v3 = vadd.f32 %v2123_v63, %v2696_v42 }
 0x282   :  { %v1589_v41 = vadd.f32 %v2235_v1, %v1428_v3  ;;  %v2124_v45 = vpop.f32.mrb[124].mxu0  ;;  %v2236_v46 = vpop.f32.mrb[124].mxu1 }
 0x283   :  { %v2125_v4 = vpop.f32.mrb[125].mxu0  ;;  %v2237_v5 = vpop.f32.mrb[125].mxu1 }
 0x284   :  { %v1996_v6 = vpack.c.bf16 %v1589_v41, %v1586_v2  ;;  %v2126_v7 = vadd.f32 %v2125_v4, %v2124_v45  ;;  %v2238_v8 = vadd.f32 %v2237_v5, %v2236_v46  ;;  %v2127_v9 = vpop.f32.mrb[126].mxu0  ;;  %v2239_v0 = vpop.f32.mrb[126].mxu1 }
 0x285   :  { %v2128_v10 = vpop.f32.mrb[127].mxu0  ;;  %v2240_v11 = vpop.f32.mrb[127].mxu1 }
 0x286   :  { %2016 = vst [vmem:[#allocation8 + $0x70] sm:$0xff] %v1996_v6   ;;  %v1433_v12 = vadd.f32 %v2126_v7, %v2696_v42  ;;  %v2129_v13 = vadd.f32 %v2128_v10, %v2127_v9  ;;  %v2241_v14 = vadd.f32 %v2240_v11, %v2239_v0 }
 0x288   :  { %v1594_v15 = vadd.f32 %v2238_v8, %v1433_v12  ;;  %v1436_v16 = vadd.f32 %v2129_v13, %v2696_v42 }
 0x28a   :  { %v1597_v17 = vadd.f32 %v2241_v14, %v1436_v16 }
 0x28c   :  { %v2001_v18 = vpack.c.bf16 %v1597_v17, %v1594_v15 }
 0x28e   :  { %2017 = vst [vmem:[#allocation8 + $0x78] sm:$0xff] %v2001_v18  }
 0x28f   :  { %2424 = shalt.err (!%p2421_p0)
}
 0x290   :  { %s2425_s12 = scalar_lea.hbm %s2750_s5, 2048 }
 0x291   :  { %p2426_p1 = scmp.ne.s32.totalorder %s2750_s5, %s2425_s12  ;;  %p2429_p2 = scmp.lt.u32.totalorder %s2425_s12, %s2750_s5 }
 0x293   :  { %p2431_p3 = pnand %p2429_p2, %p2426_p1 }
 0x295   :  { %2434 = shalt.err (!%p2431_p3)
}
 0x296   :  { %1771 = dma.vmem_to_hbm [thread:$0]  %s1766_s8, 2048, %s2750_s5, [#allocation4], %s2445_s1, %s2445_s1, %s2446_s17  }
 0x297   :  { %2439 = dma.done.wait [#allocation4], 2048  }
 0x298   :  { %2440 = vsyncadd [#allocation4], 4294965248 }
 0x299   :  { %1775 = vsyncpa [#allocation3], 1 }
 0x29a   :  { %1776 = vsyncpa [#allocation6], 1 }
 0x29b   :  { %1777 = vsyncpa [#allocation4], 1 }

</bundles_post_ra>
